<compile_context>
chip_gen: v6e
topology: v6e:2x2x1
jax: 0.10.0
libtpu: 0.0.40
codegen_flags: <defaults>
</compile_context>

<pallas_src>
import functools

import jax
import jax.numpy as jnp
from jax.experimental import pallas as pl
from jax.experimental.pallas import tpu as pltpu


def _round_up(x, m):
    return ((x + m - 1) // m) * m


def rnn_kernel(x_ref, h0_ref, w_in_ref, w_hh_ref, w_out_ref, b_pre_ref, b_out_ref,
               hid_ref, out_ref, h_final_ref, h_scr, *, activation):
    """One (batch-tile, time-chunk) grid step of the recurrence.

    x_ref      : [TB, Tc, n_in]  input chunk (batch-major)
    h0_ref     : [TB, H]         initial hidden state for this batch tile
    w_in_ref   : [n_in, H]       input weights, pre-transposed to [in, out]
    w_hh_ref   : [H, H]          sum of the 5 recurrent weight matrices
    w_out_ref  : [H, O]          output weights
    b_pre_ref  : [1, H]          b_in + sum_i b_hh_i  (folded bias)
    b_out_ref  : [1, O]
    hid_ref    : [TB, Tc, H]     per-step hidden states (batch-major)
    out_ref    : [TB, Tc, O]     per-step outputs (batch-major)
    h_final_ref: [TB, H]         hidden after the last timestep
    h_scr      : VMEM [TB, H]    hidden state carried across time chunks
    """
    t = pl.program_id(1)

    # Initialize the carried hidden state at the first time chunk of each batch tile.
    @pl.when(t == 0)
    def _():
        h_scr[...] = h0_ref[...]

    tb, tc, n_in = x_ref.shape
    hdim = h_scr.shape[1]
    odim = out_ref.shape[2]

    # Whole-chunk input projection in a single MXU pass; folded bias rides along.
    # (TB,Tc) -> TB*Tc merge keeps the lane dim intact, so the reshapes are layout-free.
    x_chunk = x_ref[...].reshape(tb * tc, n_in)
    x_proj = (jnp.dot(x_chunk, w_in_ref[...], preferred_element_type=jnp.float32)
              + b_pre_ref[...]).reshape(tb, tc, hdim)

    h = h_scr[...]
    w_hh = w_hh_ref[...]

    # Sequential recurrence over the chunk; tc is a small compile-time constant (static unroll).
    # Only the [TB,H]@[H,H] matmul is inherently serial; everything else is hoisted.
    for tau in range(tc):
        pre = x_proj[:, tau, :] + jnp.dot(h, w_hh, preferred_element_type=jnp.float32)
        if activation == 'relu':
            h = jnp.maximum(pre, 0.0)
        else:
            h = jnp.tanh(pre)
        hid_ref[:, tau, :] = h.astype(hid_ref.dtype)

    h_scr[...] = h

    # Whole-chunk output projection in a single MXU pass (reads the chunk hiddens back
    # from the VMEM output block written above).
    hid_chunk = hid_ref[...].astype(jnp.float32).reshape(tb * tc, hdim)
    out_chunk = (jnp.dot(hid_chunk, w_out_ref[...], preferred_element_type=jnp.float32)
                 + b_out_ref[...])
    out_ref[...] = out_chunk.reshape(tb, tc, odim).astype(out_ref.dtype)

    # Only the last time chunk's hidden matters for the final-hidden output.
    @pl.when(t == pl.num_programs(1) - 1)
    def _():
        h_final_ref[...] = h.astype(h_final_ref.dtype)


def rnn_forward(x, h0, params, activation='relu'):
    """x: [B, T, n_in], h0: [B, n_hid] -> (hidden_list [B,T,H], output_list [B,T,O], hidden [B,H])."""
    B, T, n_in = x.shape
    n_hid = h0.shape[1]
    n_out = params["w_out"].shape[1]
    dtype = x.dtype

    # Fold the 5 recurrent Linears: h@W1 + ... + h@W5 == h@(W1+...+W5); biases likewise.
    w_hh_sum = jnp.sum(params["w_hh"], axis=0)                   # [H, H]
    b_pre = params["b_in"] + jnp.sum(params["b_hh"], axis=0)     # [1, H]

    # Pad to vreg/MXU-friendly shapes: batch (sublane) to a multiple of 8,
    # hidden/output (lane) dims to multiples of 128.  Zero padding keeps padded
    # hidden/output columns exactly zero (relu(0)=tanh(0)=0); sliced off below.
    H = _round_up(n_hid, 128)
    O = _round_up(n_out, 128)
    Bp = _round_up(B, 8)
    TB = Bp if Bp <= 128 else 128       # batch tile per grid step (megacore-parallel axis)
    Bp = _round_up(Bp, TB)

    # Time chunk per grid step: amortize pipeline overhead across many timesteps
    # while keeping the per-chunk VMEM blocks modest.
    Tc = T
    for cand in (32, 16, 8):
        if T > cand and T % cand == 0:
            Tc = cand
            break

    def pad(a, shape):
        return jnp.pad(a, [(0, s - d) for d, s in zip(a.shape, shape)])

    x_p = pad(x.astype(jnp.float32), (Bp, T, n_in))
    h0_p = pad(h0.astype(jnp.float32), (Bp, H))
    w_in_p = pad(params["w_in"], (n_in, H))
    w_hh_p = pad(w_hh_sum, (H, H))
    w_out_p = pad(params["w_out"], (H, O))
    b_pre_p = pad(b_pre, (1, H))
    b_out_p = pad(params["b_out"], (1, O))

    grid = (Bp // TB, T // Tc)

    grid_spec = pltpu.PrefetchScalarGridSpec(
        num_scalar_prefetch=0,
        grid=grid,
        in_specs=[
            pl.BlockSpec((TB, Tc, n_in), lambda b, t: (b, t, 0)),   # x chunk (batch-major)
            pl.BlockSpec((TB, H), lambda b, t: (b, 0)),             # h0 (per batch tile)
            pl.BlockSpec((n_in, H), lambda b, t: (0, 0)),           # w_in  [in, out]
            pl.BlockSpec((H, H), lambda b, t: (0, 0)),              # sum of w_hh_1..5
            pl.BlockSpec((H, O), lambda b, t: (0, 0)),              # w_out [in, out]
            pl.BlockSpec((1, H), lambda b, t: (0, 0)),              # folded bias b_in + sum(b_hh)
            pl.BlockSpec((1, O), lambda b, t: (0, 0)),              # b_out
        ],
        out_specs=[
            pl.BlockSpec((TB, Tc, H), lambda b, t: (b, t, 0)),      # hidden_list (batch-major)
            pl.BlockSpec((TB, Tc, O), lambda b, t: (b, t, 0)),      # output_list (batch-major)
            pl.BlockSpec((TB, H), lambda b, t: (b, 0)),             # final hidden
        ],
        scratch_shapes=[pltpu.VMEM((TB, H), jnp.float32)],
    )

    hid_p, out_p, hfin_p = pl.pallas_call(
        functools.partial(rnn_kernel, activation=activation),
        out_shape=(
            jax.ShapeDtypeStruct((Bp, T, H), dtype),
            jax.ShapeDtypeStruct((Bp, T, O), dtype),
            jax.ShapeDtypeStruct((Bp, H), dtype),
        ),
        grid_spec=grid_spec,
        compiler_params=pltpu.CompilerParams(
            # Batch tiles are independent -> parallel (2-TC friendly); time is the recurrence.
            dimension_semantics=("parallel", "arbitrary"),
        ),
    )(x_p, h0_p, w_in_p, w_hh_p, w_out_p, b_pre_p, b_out_p)

    return hid_p[:B, :, :n_hid], out_p[:B, :, :n_out], hfin_p[:B, :n_hid]


def init_params(key, n_in, n_hid, n_out):
    """Deterministic parameter init mimicking nn.Linear's U(-1/sqrt(fan_in), 1/sqrt(fan_in))."""
    ks = jax.random.split(key, 16)

    def lin(kw, kb, fan_in, fan_out):
        bound = 1.0 / jnp.sqrt(fan_in)
        w = jax.random.uniform(kw, (fan_in, fan_out), jnp.float32, -bound, bound)  # [in, out]
        b = jax.random.uniform(kb, (1, fan_out), jnp.float32, -bound, bound)
        return w, b

    w_in, b_in = lin(ks[0], ks[1], n_in, n_hid)
    whh, bhh = [], []
    for i in range(5):
        w, b = lin(ks[2 + 2 * i], ks[3 + 2 * i], n_hid, n_hid)
        whh.append(w)
        bhh.append(b)
    w_out, b_out = lin(ks[12], ks[13], n_hid, n_out)

    return {
        "w_in": w_in, "b_in": b_in,
        "w_hh": jnp.stack(whh, axis=0),          # [5, n_hid, n_hid]
        "b_hh": jnp.stack(bhh, axis=0),          # [5, 1, n_hid]
        "w_out": w_out, "b_out": b_out,
    }


def rnn_reference(x, h0, params, activation='relu'):
    """Pure-JAX reference mirroring the PyTorch loop (5 separate recurrent Linears)."""
    B, T, _ = x.shape
    h = h0
    hids, outs = [], []
    for t in range(T):
        xt = x[:, t, :]
        pre = xt @ params["w_in"] + params["b_in"]
        for i in range(5):
            pre = pre + (h @ params["w_hh"][i] + params["b_hh"][i])
        h = jnp.maximum(pre, 0.0) if activation == 'relu' else jnp.tanh(pre)
        outs.append(h @ params["w_out"] + params["b_out"])
        hids.append(h)
    return jnp.stack(hids, axis=1), jnp.stack(outs, axis=1), h


if __name__ == "__main__":
    B, T, n_in, n_hid, n_out = 2, 8, 4, 32, 2

    key = jax.random.PRNGKey(0)
    k_p, k_x, k_h = jax.random.split(key, 3)
    params = init_params(k_p, n_in, n_hid, n_out)

    x = jax.random.normal(k_x, (B, T, n_in), jnp.float32)
    h0 = jax.random.normal(k_h, (B, n_hid), jnp.float32)

    hid_list, out_list, h_final = rnn_forward(x, h0, params)
    jax.block_until_ready((hid_list, out_list, h_final))

    hid_ref, out_ref, h_ref = rnn_reference(x, h0, params)
    assert hid_list.shape == (B, T, n_hid)
    assert out_list.shape == (B, T, n_out)
    assert h_final.shape == (B, n_hid)
    # Tolerance accounts for the (algebraically exact) weight-sum fold changing f32 rounding order.
    assert jnp.allclose(hid_list, hid_ref, atol=1e-4, rtol=1e-4)
    assert jnp.allclose(out_list, out_ref, atol=1e-4, rtol=1e-4)
    assert jnp.allclose(h_final, h_ref, atol=1e-4, rtol=1e-4)

    print("KERNEL_OK")
</pallas_src>

<mosaic_0001>
module attributes {stable_mosaic.version = 11 : i64} {
  func.func @rnn_kernel(%arg0: i32, %arg1: i32, %arg2: memref<8x8x4xf32, #tpu.memory_space<vmem>>, %arg3: memref<8x128xf32, #tpu.memory_space<vmem>>, %arg4: memref<4x128xf32, #tpu.memory_space<vmem>>, %arg5: memref<128x128xf32, #tpu.memory_space<vmem>>, %arg6: memref<128x128xf32, #tpu.memory_space<vmem>>, %arg7: memref<1x128xf32, #tpu.memory_space<vmem>>, %arg8: memref<1x128xf32, #tpu.memory_space<vmem>>, %arg9: memref<8x8x128xf32, #tpu.memory_space<vmem>>, %arg10: memref<8x8x128xf32, #tpu.memory_space<vmem>>, %arg11: memref<8x128xf32, #tpu.memory_space<vmem>>, %arg12: memref<8x128xf32, #tpu.memory_space<vmem>>) attributes {dimension_semantics = [#tpu.dimension_semantics<parallel>, #tpu.dimension_semantics<arbitrary>], iteration_bounds = array<i64: 1, 1>, scalar_prefetch = 0 : i64, scratch_operands = 1 : i64, tpu.core_type = #tpu.core_type<tc>, window_params = [{transform_indices = @transform_0, window_bounds = array<i64: 8, 8, 4>}, {transform_indices = @transform_1, window_bounds = array<i64: 8, 128>}, {pipeline_mode = #tpu.pipeline_mode<synchronous>, transform_indices = @transform_2, window_bounds = array<i64: 4, 128>}, {pipeline_mode = #tpu.pipeline_mode<synchronous>, transform_indices = @transform_3, window_bounds = array<i64: 128, 128>}, {pipeline_mode = #tpu.pipeline_mode<synchronous>, transform_indices = @transform_4, window_bounds = array<i64: 128, 128>}, {pipeline_mode = #tpu.pipeline_mode<synchronous>, transform_indices = @transform_5, window_bounds = array<i64: 1, 128>}, {pipeline_mode = #tpu.pipeline_mode<synchronous>, transform_indices = @transform_6, window_bounds = array<i64: 1, 128>}, {transform_indices = @transform_7, window_bounds = array<i64: 8, 8, 128>}, {transform_indices = @transform_8, window_bounds = array<i64: 8, 8, 128>}, {transform_indices = @transform_9, window_bounds = array<i64: 8, 128>}]} {
    %c0_i32 = arith.constant 0 : i32
    %0 = arith.cmpi eq, %arg1, %c0_i32 : i32
    %1 = arith.extui %0 : i1 to i32
    %c0_i32_0 = arith.constant 0 : i32
    %2 = arith.cmpi ne, %1, %c0_i32_0 : i32
    scf.if %2 {
      %c0_59 = arith.constant 0 : index
      %c0_60 = arith.constant 0 : index
      %98 = vector.load %arg3[%c0_59, %c0_60] : memref<8x128xf32, #tpu.memory_space<vmem>>, vector<8x128xf32>
      %c0_61 = arith.constant 0 : index
      %c0_62 = arith.constant 0 : index
      %99 = vector.load %arg12[%c0_61, %c0_62] : memref<8x128xf32, #tpu.memory_space<vmem>>, vector<8x128xf32>
      tpu.vector_store %arg12[%c0_61, %c0_62], %98 {strides = array<i32>} : memref<8x128xf32, #tpu.memory_space<vmem>>, vector<8x128xf32>,
    } else {
    }
    %c0 = arith.constant 0 : index
    %c0_1 = arith.constant 0 : index
    %c0_2 = arith.constant 0 : index
    %3 = vector.load %arg2[%c0, %c0_1, %c0_2] : memref<8x8x4xf32, #tpu.memory_space<vmem>>, vector<8x8x4xf32>
    %4 = vector.shape_cast %3 : vector<8x8x4xf32> to vector<64x4xf32>
    %c0_3 = arith.constant 0 : index
    %c0_4 = arith.constant 0 : index
    %5 = vector.load %arg4[%c0_3, %c0_4] : memref<4x128xf32, #tpu.memory_space<vmem>>, vector<4x128xf32>
    %cst = arith.constant dense<0.000000e+00> : vector<64x128xf32>
    %6 = tpu.matmul %4, %5, %cst {dimension_numbers = #tpu.dot_dimension_numbers<[1], [0], [0], [1], [0, 0, 1, 1], [], []>} : vector<64x4xf32>, vector<4x128xf32>, vector<64x128xf32> -> vector<64x128xf32>
    %c0_5 = arith.constant 0 : index
    %c0_6 = arith.constant 0 : index
    %7 = vector.load %arg7[%c0_5, %c0_6] : memref<1x128xf32, #tpu.memory_space<vmem>>, vector<1x128xf32>
    %8 = vector.broadcast %7 : vector<1x128xf32> to vector<64x128xf32>
    %9 = arith.addf %6, %8 : vector<64x128xf32>
    %10 = vector.shape_cast %9 : vector<64x128xf32> to vector<8x8x128xf32>
    %c0_7 = arith.constant 0 : index
    %c0_8 = arith.constant 0 : index
    %11 = vector.load %arg12[%c0_7, %c0_8] : memref<8x128xf32, #tpu.memory_space<vmem>>, vector<8x128xf32>
    %c0_9 = arith.constant 0 : index
    %c0_10 = arith.constant 0 : index
    %12 = vector.load %arg5[%c0_9, %c0_10] : memref<128x128xf32, #tpu.memory_space<vmem>>, vector<128x128xf32>
    %13 = vector.extract_strided_slice %10 {offsets = [0, 0, 0], sizes = [8, 1, 128], strides = [1, 1, 1]} : vector<8x8x128xf32> to vector<8x1x128xf32>
    %14 = vector.shape_cast %13 : vector<8x1x128xf32> to vector<8x128xf32>
    %cst_11 = arith.constant dense<0.000000e+00> : vector<8x128xf32>
    %15 = tpu.matmul %11, %12, %cst_11 {dimension_numbers = #tpu.dot_dimension_numbers<[1], [0], [0], [1], [0, 0, 1, 1], [], []>} : vector<8x128xf32>, vector<128x128xf32>, vector<8x128xf32> -> vector<8x128xf32>
    %16 = arith.addf %14, %15 : vector<8x128xf32>
    %cst_12 = arith.constant 0.000000e+00 : f32
    %17 = vector.broadcast %cst_12 : f32 to vector<8x128xf32>
    %18 = arith.maximumf %16, %17 : vector<8x128xf32>
    %c0_13 = arith.constant 0 : index
    %c0_14 = arith.constant 0 : index
    %c0_15 = arith.constant 0 : index
    %19 = vector.load %arg9[%c0_13, %c0_14, %c0_15] : memref<8x8x128xf32, #tpu.memory_space<vmem>>, vector<8x1x128xf32>
    %20 = vector.shape_cast %19 : vector<8x1x128xf32> to vector<8x128xf32>
    %21 = vector.shape_cast %18 : vector<8x128xf32> to vector<8x1x128xf32>
    tpu.vector_store %arg9[%c0_13, %c0_14, %c0_15], %21 {strides = array<i32>} : memref<8x8x128xf32, #tpu.memory_space<vmem>>, vector<8x1x128xf32>,
    %22 = vector.extract_strided_slice %10 {offsets = [0, 1, 0], sizes = [8, 1, 128], strides = [1, 1, 1]} : vector<8x8x128xf32> to vector<8x1x128xf32>
    %23 = vector.shape_cast %22 : vector<8x1x128xf32> to vector<8x128xf32>
    %cst_16 = arith.constant dense<0.000000e+00> : vector<8x128xf32>
    %24 = tpu.matmul %18, %12, %cst_16 {dimension_numbers = #tpu.dot_dimension_numbers<[1], [0], [0], [1], [0, 0, 1, 1], [], []>} : vector<8x128xf32>, vector<128x128xf32>, vector<8x128xf32> -> vector<8x128xf32>
    %25 = arith.addf %23, %24 : vector<8x128xf32>
    %cst_17 = arith.constant 0.000000e+00 : f32
    %26 = vector.broadcast %cst_17 : f32 to vector<8x128xf32>
    %27 = arith.maximumf %25, %26 : vector<8x128xf32>
    %c0_18 = arith.constant 0 : index
    %c1 = arith.constant 1 : index
    %c0_19 = arith.constant 0 : index
    %28 = vector.load %arg9[%c0_18, %c1, %c0_19] : memref<8x8x128xf32, #tpu.memory_space<vmem>>, vector<8x1x128xf32>
    %29 = vector.shape_cast %28 : vector<8x1x128xf32> to vector<8x128xf32>
    %30 = vector.shape_cast %27 : vector<8x128xf32> to vector<8x1x128xf32>
    tpu.vector_store %arg9[%c0_18, %c1, %c0_19], %30 {strides = array<i32>} : memref<8x8x128xf32, #tpu.memory_space<vmem>>, vector<8x1x128xf32>,
    %31 = vector.extract_strided_slice %10 {offsets = [0, 2, 0], sizes = [8, 1, 128], strides = [1, 1, 1]} : vector<8x8x128xf32> to vector<8x1x128xf32>
    %32 = vector.shape_cast %31 : vector<8x1x128xf32> to vector<8x128xf32>
    %cst_20 = arith.constant dense<0.000000e+00> : vector<8x128xf32>
    %33 = tpu.matmul %27, %12, %cst_20 {dimension_numbers = #tpu.dot_dimension_numbers<[1], [0], [0], [1], [0, 0, 1, 1], [], []>} : vector<8x128xf32>, vector<128x128xf32>, vector<8x128xf32> -> vector<8x128xf32>
    %34 = arith.addf %32, %33 : vector<8x128xf32>
    %cst_21 = arith.constant 0.000000e+00 : f32
    %35 = vector.broadcast %cst_21 : f32 to vector<8x128xf32>
    %36 = arith.maximumf %34, %35 : vector<8x128xf32>
    %c0_22 = arith.constant 0 : index
    %c2 = arith.constant 2 : index
    %c0_23 = arith.constant 0 : index
    %37 = vector.load %arg9[%c0_22, %c2, %c0_23] : memref<8x8x128xf32, #tpu.memory_space<vmem>>, vector<8x1x128xf32>
    %38 = vector.shape_cast %37 : vector<8x1x128xf32> to vector<8x128xf32>
    %39 = vector.shape_cast %36 : vector<8x128xf32> to vector<8x1x128xf32>
    tpu.vector_store %arg9[%c0_22, %c2, %c0_23], %39 {strides = array<i32>} : memref<8x8x128xf32, #tpu.memory_space<vmem>>, vector<8x1x128xf32>,
    %40 = vector.extract_strided_slice %10 {offsets = [0, 3, 0], sizes = [8, 1, 128], strides = [1, 1, 1]} : vector<8x8x128xf32> to vector<8x1x128xf32>
    %41 = vector.shape_cast %40 : vector<8x1x128xf32> to vector<8x128xf32>
    %cst_24 = arith.constant dense<0.000000e+00> : vector<8x128xf32>
    %42 = tpu.matmul %36, %12, %cst_24 {dimension_numbers = #tpu.dot_dimension_numbers<[1], [0], [0], [1], [0, 0, 1, 1], [], []>} : vector<8x128xf32>, vector<128x128xf32>, vector<8x128xf32> -> vector<8x128xf32>
    %43 = arith.addf %41, %42 : vector<8x128xf32>
    %cst_25 = arith.constant 0.000000e+00 : f32
    %44 = vector.broadcast %cst_25 : f32 to vector<8x128xf32>
    %45 = arith.maximumf %43, %44 : vector<8x128xf32>
    %c0_26 = arith.constant 0 : index
    %c3 = arith.constant 3 : index
    %c0_27 = arith.constant 0 : index
    %46 = vector.load %arg9[%c0_26, %c3, %c0_27] : memref<8x8x128xf32, #tpu.memory_space<vmem>>, vector<8x1x128xf32>
    %47 = vector.shape_cast %46 : vector<8x1x128xf32> to vector<8x128xf32>
    %48 = vector.shape_cast %45 : vector<8x128xf32> to vector<8x1x128xf32>
    tpu.vector_store %arg9[%c0_26, %c3, %c0_27], %48 {strides = array<i32>} : memref<8x8x128xf32, #tpu.memory_space<vmem>>, vector<8x1x128xf32>,
    %49 = vector.extract_strided_slice %10 {offsets = [0, 4, 0], sizes = [8, 1, 128], strides = [1, 1, 1]} : vector<8x8x128xf32> to vector<8x1x128xf32>
    %50 = vector.shape_cast %49 : vector<8x1x128xf32> to vector<8x128xf32>
    %cst_28 = arith.constant dense<0.000000e+00> : vector<8x128xf32>
    %51 = tpu.matmul %45, %12, %cst_28 {dimension_numbers = #tpu.dot_dimension_numbers<[1], [0], [0], [1], [0, 0, 1, 1], [], []>} : vector<8x128xf32>, vector<128x128xf32>, vector<8x128xf32> -> vector<8x128xf32>
    %52 = arith.addf %50, %51 : vector<8x128xf32>
    %cst_29 = arith.constant 0.000000e+00 : f32
    %53 = vector.broadcast %cst_29 : f32 to vector<8x128xf32>
    %54 = arith.maximumf %52, %53 : vector<8x128xf32>
    %c0_30 = arith.constant 0 : index
    %c4 = arith.constant 4 : index
    %c0_31 = arith.constant 0 : index
    %55 = vector.load %arg9[%c0_30, %c4, %c0_31] : memref<8x8x128xf32, #tpu.memory_space<vmem>>, vector<8x1x128xf32>
    %56 = vector.shape_cast %55 : vector<8x1x128xf32> to vector<8x128xf32>
    %57 = vector.shape_cast %54 : vector<8x128xf32> to vector<8x1x128xf32>
    tpu.vector_store %arg9[%c0_30, %c4, %c0_31], %57 {strides = array<i32>} : memref<8x8x128xf32, #tpu.memory_space<vmem>>, vector<8x1x128xf32>,
    %58 = vector.extract_strided_slice %10 {offsets = [0, 5, 0], sizes = [8, 1, 128], strides = [1, 1, 1]} : vector<8x8x128xf32> to vector<8x1x128xf32>
    %59 = vector.shape_cast %58 : vector<8x1x128xf32> to vector<8x128xf32>
    %cst_32 = arith.constant dense<0.000000e+00> : vector<8x128xf32>
    %60 = tpu.matmul %54, %12, %cst_32 {dimension_numbers = #tpu.dot_dimension_numbers<[1], [0], [0], [1], [0, 0, 1, 1], [], []>} : vector<8x128xf32>, vector<128x128xf32>, vector<8x128xf32> -> vector<8x128xf32>
    %61 = arith.addf %59, %60 : vector<8x128xf32>
    %cst_33 = arith.constant 0.000000e+00 : f32
    %62 = vector.broadcast %cst_33 : f32 to vector<8x128xf32>
    %63 = arith.maximumf %61, %62 : vector<8x128xf32>
    %c0_34 = arith.constant 0 : index
    %c5 = arith.constant 5 : index
    %c0_35 = arith.constant 0 : index
    %64 = vector.load %arg9[%c0_34, %c5, %c0_35] : memref<8x8x128xf32, #tpu.memory_space<vmem>>, vector<8x1x128xf32>
    %65 = vector.shape_cast %64 : vector<8x1x128xf32> to vector<8x128xf32>
    %66 = vector.shape_cast %63 : vector<8x128xf32> to vector<8x1x128xf32>
    tpu.vector_store %arg9[%c0_34, %c5, %c0_35], %66 {strides = array<i32>} : memref<8x8x128xf32, #tpu.memory_space<vmem>>, vector<8x1x128xf32>,
    %67 = vector.extract_strided_slice %10 {offsets = [0, 6, 0], sizes = [8, 1, 128], strides = [1, 1, 1]} : vector<8x8x128xf32> to vector<8x1x128xf32>
    %68 = vector.shape_cast %67 : vector<8x1x128xf32> to vector<8x128xf32>
    %cst_36 = arith.constant dense<0.000000e+00> : vector<8x128xf32>
    %69 = tpu.matmul %63, %12, %cst_36 {dimension_numbers = #tpu.dot_dimension_numbers<[1], [0], [0], [1], [0, 0, 1, 1], [], []>} : vector<8x128xf32>, vector<128x128xf32>, vector<8x128xf32> -> vector<8x128xf32>
    %70 = arith.addf %68, %69 : vector<8x128xf32>
    %cst_37 = arith.constant 0.000000e+00 : f32
    %71 = vector.broadcast %cst_37 : f32 to vector<8x128xf32>
    %72 = arith.maximumf %70, %71 : vector<8x128xf32>
    %c0_38 = arith.constant 0 : index
    %c6 = arith.constant 6 : index
    %c0_39 = arith.constant 0 : index
    %73 = vector.load %arg9[%c0_38, %c6, %c0_39] : memref<8x8x128xf32, #tpu.memory_space<vmem>>, vector<8x1x128xf32>
    %74 = vector.shape_cast %73 : vector<8x1x128xf32> to vector<8x128xf32>
    %75 = vector.shape_cast %72 : vector<8x128xf32> to vector<8x1x128xf32>
    tpu.vector_store %arg9[%c0_38, %c6, %c0_39], %75 {strides = array<i32>} : memref<8x8x128xf32, #tpu.memory_space<vmem>>, vector<8x1x128xf32>,
    %76 = vector.extract_strided_slice %10 {offsets = [0, 7, 0], sizes = [8, 1, 128], strides = [1, 1, 1]} : vector<8x8x128xf32> to vector<8x1x128xf32>
    %77 = vector.shape_cast %76 : vector<8x1x128xf32> to vector<8x128xf32>
    %cst_40 = arith.constant dense<0.000000e+00> : vector<8x128xf32>
    %78 = tpu.matmul %72, %12, %cst_40 {dimension_numbers = #tpu.dot_dimension_numbers<[1], [0], [0], [1], [0, 0, 1, 1], [], []>} : vector<8x128xf32>, vector<128x128xf32>, vector<8x128xf32> -> vector<8x128xf32>
    %79 = arith.addf %77, %78 : vector<8x128xf32>
    %cst_41 = arith.constant 0.000000e+00 : f32
    %80 = vector.broadcast %cst_41 : f32 to vector<8x128xf32>
    %81 = arith.maximumf %79, %80 : vector<8x128xf32>
    %c0_42 = arith.constant 0 : index
    %c7 = arith.constant 7 : index
    %c0_43 = arith.constant 0 : index
    %82 = vector.load %arg9[%c0_42, %c7, %c0_43] : memref<8x8x128xf32, #tpu.memory_space<vmem>>, vector<8x1x128xf32>
    %83 = vector.shape_cast %82 : vector<8x1x128xf32> to vector<8x128xf32>
    %84 = vector.shape_cast %81 : vector<8x128xf32> to vector<8x1x128xf32>
    tpu.vector_store %arg9[%c0_42, %c7, %c0_43], %84 {strides = array<i32>} : memref<8x8x128xf32, #tpu.memory_space<vmem>>, vector<8x1x128xf32>,
    %c0_44 = arith.constant 0 : index
    %c0_45 = arith.constant 0 : index
    %85 = vector.load %arg12[%c0_44, %c0_45] : memref<8x128xf32, #tpu.memory_space<vmem>>, vector<8x128xf32>
    tpu.vector_store %arg12[%c0_44, %c0_45], %81 {strides = array<i32>} : memref<8x128xf32, #tpu.memory_space<vmem>>, vector<8x128xf32>,
    %c0_46 = arith.constant 0 : index
    %c0_47 = arith.constant 0 : index
    %c0_48 = arith.constant 0 : index
    %86 = vector.load %arg9[%c0_46, %c0_47, %c0_48] : memref<8x8x128xf32, #tpu.memory_space<vmem>>, vector<8x8x128xf32>
    %87 = vector.shape_cast %86 : vector<8x8x128xf32> to vector<64x128xf32>
    %c0_49 = arith.constant 0 : index
    %c0_50 = arith.constant 0 : index
    %88 = vector.load %arg6[%c0_49, %c0_50] : memref<128x128xf32, #tpu.memory_space<vmem>>, vector<128x128xf32>
    %cst_51 = arith.constant dense<0.000000e+00> : vector<64x128xf32>
    %89 = tpu.matmul %87, %88, %cst_51 {dimension_numbers = #tpu.dot_dimension_numbers<[1], [0], [0], [1], [0, 0, 1, 1], [], []>} : vector<64x128xf32>, vector<128x128xf32>, vector<64x128xf32> -> vector<64x128xf32>
    %c0_52 = arith.constant 0 : index
    %c0_53 = arith.constant 0 : index
    %90 = vector.load %arg8[%c0_52, %c0_53] : memref<1x128xf32, #tpu.memory_space<vmem>>, vector<1x128xf32>
    %91 = vector.broadcast %90 : vector<1x128xf32> to vector<64x128xf32>
    %92 = arith.addf %89, %91 : vector<64x128xf32>
    %93 = vector.shape_cast %92 : vector<64x128xf32> to vector<8x8x128xf32>
    %c0_54 = arith.constant 0 : index
    %c0_55 = arith.constant 0 : index
    %c0_56 = arith.constant 0 : index
    %94 = vector.load %arg10[%c0_54, %c0_55, %c0_56] : memref<8x8x128xf32, #tpu.memory_space<vmem>>, vector<8x8x128xf32>
    tpu.vector_store %arg10[%c0_54, %c0_55, %c0_56], %93 {strides = array<i32>} : memref<8x8x128xf32, #tpu.memory_space<vmem>>, vector<8x8x128xf32>,
    %c0_i32_57 = arith.constant 0 : i32
    %95 = arith.cmpi eq, %arg1, %c0_i32_57 : i32
    %96 = arith.extui %95 : i1 to i32
    %c0_i32_58 = arith.constant 0 : i32
    %97 = arith.cmpi ne, %96, %c0_i32_58 : i32
    scf.if %97 {
      %c0_59 = arith.constant 0 : index
      %c0_60 = arith.constant 0 : index
      %98 = vector.load %arg11[%c0_59, %c0_60] : memref<8x128xf32, #tpu.memory_space<vmem>>, vector<8x128xf32>
      tpu.vector_store %arg11[%c0_59, %c0_60], %81 {strides = array<i32>} : memref<8x128xf32, #tpu.memory_space<vmem>>, vector<8x128xf32>,
    } else {
    }
    return
  }
  func.func @transform_0(%arg0: i32, %arg1: i32) -> (i32, i32, i32) {
    %c0_i32 = arith.constant 0 : i32
    %c0_i32_0 = arith.constant 0 : i32
    return %arg0, %arg1, %c0_i32 : i32, i32, i32
  }
  func.func @transform_1(%arg0: i32, %arg1: i32) -> (i32, i32) {
    %c0_i32 = arith.constant 0 : i32
    %c0_i32_0 = arith.constant 0 : i32
    return %arg0, %c0_i32 : i32, i32
  }
  func.func @transform_2(%arg0: i32, %arg1: i32) -> (i32, i32) {
    %c0_i32 = arith.constant 0 : i32
    %c0_i32_0 = arith.constant 0 : i32
    %c0_i32_1 = arith.constant 0 : i32
    return %c0_i32, %c0_i32_0 : i32, i32
  }
  func.func @transform_3(%arg0: i32, %arg1: i32) -> (i32, i32) {
    %c0_i32 = arith.constant 0 : i32
    %c0_i32_0 = arith.constant 0 : i32
    %c0_i32_1 = arith.constant 0 : i32
    return %c0_i32, %c0_i32_0 : i32, i32
  }
  func.func @transform_4(%arg0: i32, %arg1: i32) -> (i32, i32) {
    %c0_i32 = arith.constant 0 : i32
    %c0_i32_0 = arith.constant 0 : i32
    %c0_i32_1 = arith.constant 0 : i32
    return %c0_i32, %c0_i32_0 : i32, i32
  }
  func.func @transform_5(%arg0: i32, %arg1: i32) -> (i32, i32) {
    %c0_i32 = arith.constant 0 : i32
    %c0_i32_0 = arith.constant 0 : i32
    %c0_i32_1 = arith.constant 0 : i32
    return %c0_i32, %c0_i32_0 : i32, i32
  }
  func.func @transform_6(%arg0: i32, %arg1: i32) -> (i32, i32) {
    %c0_i32 = arith.constant 0 : i32
    %c0_i32_0 = arith.constant 0 : i32
    %c0_i32_1 = arith.constant 0 : i32
    return %c0_i32, %c0_i32_0 : i32, i32
  }
  func.func @transform_7(%arg0: i32, %arg1: i32) -> (i32, i32, i32) {
    %c0_i32 = arith.constant 0 : i32
    %c0_i32_0 = arith.constant 0 : i32
    return %arg0, %arg1, %c0_i32 : i32, i32, i32
  }
  func.func @transform_8(%arg0: i32, %arg1: i32) -> (i32, i32, i32) {
    %c0_i32 = arith.constant 0 : i32
    %c0_i32_0 = arith.constant 0 : i32
    return %arg0, %arg1, %c0_i32 : i32, i32, i32
  }
  func.func @transform_9(%arg0: i32, %arg1: i32) -> (i32, i32) {
    %c0_i32 = arith.constant 0 : i32
    %c0_i32_0 = arith.constant 0 : i32
    return %arg0, %c0_i32 : i32, i32
  }
}

</mosaic_0001>

<bundles_post_ra>
// kernel: tpu_custom_call.1
= control target key start
LH: loop header
LB: loop body
LE: loop exit
PB: predicated region body
PF: predicated region fallthrough
CT: control target
= control target key end

     0   :  { %15 = vsyncpa [#allocation4], 0  ;;  %s2705_s0 = inlined_call_operand.vmem [shape: f32[8,8,4], index: 0, kind: input, shape index: {}]   ;;  %s2706_s1 = inlined_call_operand.vmem [shape: f32[8,128], index: 1, kind: input, shape index: {}]   ;;  %s2707_s2 = inlined_call_operand.vmem [shape: f32[4,128], index: 2, kind: input, shape index: {}]   ;;  %s2708_s3 = inlined_call_operand.hbm [shape: f32[128,128], index: 3, kind: input, shape index: {}]   ;;  %s2709_s4 = inlined_call_operand.hbm [shape: f32[128,128], index: 4, kind: input, shape index: {}]   ;;  %s2710_s5 = inlined_call_operand.vmem [shape: f32[1,128], index: 5, kind: input, shape index: {}]   ;;  %s2711_s6 = inlined_call_operand.vmem [shape: f32[1,128], index: 6, kind: input, shape index: {}]   ;;  %s2712_s7 = inlined_call_operand.hbm [shape: f32[8,8,128], index: 7, kind: output, shape index: {0}]   ;;  %s2713_s8 = inlined_call_operand.hbm [shape: f32[8,8,128], index: 8, kind: output, shape index: {1}]   ;;  %s2714_s9 = inlined_call_operand.hbm [shape: f32[8,128], index: 9, kind: output, shape index: {2}]  }
   0x1   :  { %16 = vsyncpa [#allocation7], 0 }
   0x2   :  { %17 = vsyncpa [#allocation5], 0 }
   0x3   :  { %18 = vsyncpa [#allocation10], 0  ;;  %s2143_s30 = smov [#allocation3]  }
   0x4   :  { %s30_s10 = sshll.u32 %s2143_s30, 4  ;;  %s31_s10 = int_to_ptr.vmem [resolvable:$true] %s30_s10 }
   0x5   :  { %s2043_s11 = scalar_lea.vmem %s31_s10, 2048  ;;  %p2048_p1 = scmp.lt.s32.totalorder %s31_s10, %s31_s10 }
   0x6   :  { %p2044_p0 = scmp.ne.s32.totalorder %s31_s10, %s2043_s11  ;;  %p2049_p2 = scmp.lt.s32.totalorder %s2043_s11, %s2043_s11 }
   0x8   :  { %p2050_p3 = por %p2049_p2, %p2048_p1 }
   0xa   :  { %p2051_p4 = pnand %p2050_p3, %p2044_p0 }
   0xc   :  { %2054 = shalt.err (!%p2051_p4)
}
   0xd   :  { %s2144_s12 = smov 128   ;;  %s2145_s13 = smov 8  }
   0xe   :  { %36 = dma.hbm_to_vmem [thread:$0]  %s2708_s3, 2048, %s31_s10, [#allocation4], %s2144_s12, %s2144_s12, %s2145_s13  }
   0xf   :  { %s2146_s16 = smov [#allocation6]  }
  0x10   :  { %s42_s17 = sshll.u32 %s2146_s16, 4  ;;  %s43_s17 = int_to_ptr.vmem [resolvable:$true] %s42_s17 }
  0x11   :  { %s2063_s18 = scalar_lea.vmem %s43_s17, 2048  ;;  %p2068_p6 = scmp.lt.s32.totalorder %s43_s17, %s43_s17 }
  0x12   :  { %p2064_p5 = scmp.ne.s32.totalorder %s43_s17, %s2063_s18  ;;  %p2069_p7 = scmp.lt.s32.totalorder %s2063_s18, %s2063_s18 }
  0x14   :  { %p2070_p8 = por %p2069_p7, %p2068_p6 }
  0x16   :  { %p2071_p9 = pnand %p2070_p8, %p2064_p5 }
  0x18   :  { %2074 = shalt.err (!%p2071_p9)
}
  0x19   :  { %48 = dma.hbm_to_vmem [thread:$0]  %s2709_s4, 2048, %s43_s17, [#allocation7], %s2144_s12, %s2144_s12, %s2145_s13  }
  0x1a   :  { %2135 = dma.done.wait [#allocation4], 2048  }
  0x1b   :  { %2136 = vsyncadd [#allocation4], 4294965248 }
  0x1c   :  { %2137 = dma.done.wait [#allocation7], 2048  }
  0x1d   :  { %2138 = vsyncadd [#allocation7], 4294965248  ;;  %v2147_v0 = vmov 0.0   ;;  %vm2148_vm0 = vmmov 0   ;;  %v2217_v1 = vld [vmem:[#allocation3 + $0x78] sm:$0xff]  ;;  %v2219_v2 = vld [vmem:[#allocation3 + $0x70] sm:$0xff] }
  0x1e   :  { %1695 = vmatprep.subr.mxu0 %v2147_v0  ;;  %1727 = vmatprep.mubr.msk.f32.mxu0 %vm2148_vm0, %v2147_v0  ;;  %vm106_vm1 = vcmask 1043456   ;;  %v2223_v3 = vld [vmem:[#allocation3 + $0x68] sm:$0xff]  ;;  %v73_v4 = vld [vmem:[%s2707_s2] sm:$0xf]  ;;  %vm81_vm2 = vcmask 31744   ;;  %v67_v8 = vld [vmem:[%s2705_s0 + $0x10] sm:$0xff] }
  0x1f   :  { %1696 = vmatpush3.msra.mxu0 %v2217_v1  ;;  %1681 = vmatprep.subr.msk.mxu1 %vm106_vm1, %v73_v4  ;;  %v65_v5 = vld [vmem:[%s2705_s0] sm:$0xff]  ;;  %v66_v6 = vld [vmem:[%s2705_s0 + $0x8] sm:$0xff]  ;;  %v2244_v9 = vld [vmem:[#allocation3 + $0x58] sm:$0xff]  ;;  %vm351_vm3 = vcmask 1041409   ;;  %vm354_vm4 = vcmask 1042434   ;;  %vm357_vm5 = vcmask 1043459  }
  0x20   :  { %1697 = vmatprep.subr.mxu0 %v2147_v0  ;;  %v2236_v7 = vld [vmem:[#allocation3 + $0x60] sm:$0xff]  ;;  %1682 = vmatpush3.msk.msra.mxu1 %vm106_vm1, %v73_v4  ;;  %v68_v10 = vld [vmem:[%s2705_s0 + $0x18] sm:$0xff]  ;;  %v2253_v11 = vld [vmem:[#allocation3 + $0x50] sm:$0xff]  ;;  %vm360_vm6 = vcmask 1044484   ;;  %vm363_vm7 = vcmask 1045509   ;;  %vm366_vm8 = vcmask 1046534  }
  0x21   :  { %1698 = vmatpush3.msra.mxu0 %v2219_v2  ;;  %1683 = vmatprep.mubr.msk.f32.mxu1 %vm81_vm2, %v65_v5  ;;  %v69_v12 = vld [vmem:[%s2705_s0 + $0x20] sm:$0xff]  ;;  %v2265_v14 = vld [vmem:[#allocation3 + $0x48] sm:$0xff]  ;;  %v71_v17 = vld [vmem:[%s2705_s0 + $0x30] sm:$0xff]  ;;  %vm369_vm9 = vcmask 1047559  }
  0x22   :  { %1699 = vmatprep.subr.mxu0 %v2147_v0  ;;  %1684 = vmatmul.mubr.msk.f32.vlgmr.msra.gmra.mxu1 %vm81_vm2, %v66_v6  ;;  %v63_v13 = vld [vmem:[%s2706_s1] sm:$0xff]  ;;  %v70_v15 = vld [vmem:[%s2705_s0 + $0x28] sm:$0xff]  ;;  %v2283_v18 = vld [vmem:[#allocation3 + $0x38] sm:$0xff] }
  0x23   :  { %1700 = vmatpush3.msra.mxu0 %v2223_v3  ;;  %1686 = vmatprep.mubr.msk.f32.mxu1 %vm81_vm2, %v67_v8  ;;  %v2274_v16 = vld [vmem:[#allocation3 + $0x40] sm:$0xff]  ;;  %v72_v19 = vld [vmem:[%s2705_s0 + $0x38] sm:$0xff]  ;;  %v2292_v20 = vld [vmem:[#allocation3 + $0x30] sm:$0xff] }
  0x24   :  { %1701 = vmatprep.subr.mxu0 %v2147_v0  ;;  %1765 = vmatprep.subr.mxu1 %v2147_v0  ;;  %v2298_v21 = vld [vmem:[#allocation3 + $0x28] sm:$0xff]  ;;  %v2304_v22 = vld [vmem:[#allocation3 + $0x20] sm:$0xff]  ;;  %v2310_v23 = vld [vmem:[#allocation3 + $0x18] sm:$0xff] }
  0x25   :  { %1702 = vmatpush3.msra.mxu0 %v2236_v7  ;;  %1766 = vmatpush3.msra.mxu1 %v2217_v1  ;;  %v2316_v24 = vld [vmem:[#allocation3 + $0x10] sm:$0xff]  ;;  %v2322_v25 = vld [vmem:[#allocation3 + $0x8] sm:$0xff]  ;;  %v2328_v26 = vld [vmem:[#allocation3] sm:$0xff] }
  0x26   :  { %1703 = vmatprep.subr.mxu0 %v2147_v0  ;;  %1687 = vmatmul.mubr.msk.f32.gmra.mxu1 %vm81_vm2, %v68_v10  ;;  %v1501_v34 = vld [vmem:[%s2710_s5] ss:$0 sm:$0xff]  ;;  %s2149_s5 = smov [#allocation8]  }
  0x27   :  { %1704 = vmatpush3.msra.mxu0 %v2244_v9  ;;  %1689 = vmatprep.mubr.msk.f32.mxu1 %vm81_vm2, %v69_v12  ;;  %s1459_s19 = sshll.u32 %s2149_s5, 4  ;;  %s1460_s19 = int_to_ptr.vmem [resolvable:$true] %s1459_s19 }
  0x28   :  { %1705 = vmatprep.subr.mxu0 %v2147_v0  ;;  %1767 = vmatprep.subr.mxu1 %v2147_v0  ;;  %s2075_s20 = scalar_lea.vmem %s1460_s19, 1024  ;;  %p2080_p11 = scmp.lt.s32.totalorder %s1460_s19, %s1460_s19 }
  0x29   :  { %1706 = vmatpush3.msra.mxu0 %v2253_v11  ;;  %1768 = vmatpush3.msra.mxu1 %v2219_v2  ;;  %p2076_p10 = scmp.ne.s32.totalorder %s1460_s19, %s2075_s20  ;;  %p2081_p12 = scmp.lt.s32.totalorder %s2075_s20, %s2075_s20 }
  0x2a   :  { %1707 = vmatprep.subr.mxu0 %v2147_v0  ;;  %1690 = vmatmul.mubr.msk.f32.gmra.mxu1 %vm81_vm2, %v70_v15 }
  0x2b   :  { %1708 = vmatpush3.msra.mxu0 %v2265_v14  ;;  %1692 = vmatprep.mubr.msk.f32.mxu1 %vm81_vm2, %v71_v17  ;;  %p2082_p13 = por %p2081_p12, %p2080_p11 }
  0x2c   :  { %1709 = vmatprep.subr.mxu0 %v2147_v0  ;;  %1769 = vmatprep.subr.mxu1 %v2147_v0 }
  0x2d   :  { %1710 = vmatpush3.msra.mxu0 %v2274_v16  ;;  %1770 = vmatpush3.msra.mxu1 %v2223_v3  ;;  %p2083_p0 = pnand %p2082_p13, %p2076_p10 }
  0x2e   :  { %1711 = vmatprep.subr.mxu0 %v2147_v0  ;;  %1693 = vmatmul.mubr.msk.f32.gmra.mxu1 %vm81_vm2, %v72_v19 }
  0x2f   :  { %1712 = vmatpush3.msra.mxu0 %v2283_v18  ;;  %1771 = vmatprep.subr.mxu1 %v2147_v0 }
  0x30   :  { %1713 = vmatprep.subr.mxu0 %v2147_v0  ;;  %1772 = vmatpush3.msra.mxu1 %v2236_v7 }
  0x31   :  { %1714 = vmatpush3.msra.mxu0 %v2292_v20  ;;  %1773 = vmatprep.subr.mxu1 %v2147_v0 }
  0x32   :  { %1715 = vmatprep.subr.mxu0 %v2147_v0  ;;  %1774 = vmatpush3.msra.mxu1 %v2244_v9 }
  0x33   :  { %1716 = vmatpush3.msra.mxu0 %v2298_v21  ;;  %1775 = vmatprep.subr.mxu1 %v2147_v0 }
  0x34   :  { %1717 = vmatprep.subr.mxu0 %v2147_v0  ;;  %1776 = vmatpush3.msra.mxu1 %v2253_v11 }
  0x35   :  { %1718 = vmatpush3.msra.mxu0 %v2304_v22  ;;  %1777 = vmatprep.subr.mxu1 %v2147_v0 }
  0x36   :  { %1719 = vmatprep.subr.mxu0 %v2147_v0  ;;  %1778 = vmatpush3.msra.mxu1 %v2265_v14 }
  0x37   :  { %1720 = vmatpush3.msra.mxu0 %v2310_v23  ;;  %1779 = vmatprep.subr.mxu1 %v2147_v0 }
  0x38   :  { %1721 = vmatprep.subr.mxu0 %v2147_v0  ;;  %1780 = vmatpush3.msra.mxu1 %v2274_v16 }
  0x39   :  { %1722 = vmatpush3.msra.mxu0 %v2316_v24  ;;  %1781 = vmatprep.subr.mxu1 %v2147_v0 }
  0x3a   :  { %1723 = vmatprep.subr.mxu0 %v2147_v0  ;;  %1782 = vmatpush3.msra.mxu1 %v2283_v18 }
  0x3b   :  { %1724 = vmatpush3.msra.mxu0 %v2322_v25  ;;  %1783 = vmatprep.subr.mxu1 %v2147_v0 }
  0x3c   :  { %1725 = vmatprep.subr.mxu0 %v2147_v0  ;;  %1784 = vmatpush3.msra.mxu1 %v2292_v20 }
  0x3d   :  { %1726 = vmatpush3.msra.mxu0 %v2328_v26  ;;  %1785 = vmatprep.subr.mxu1 %v2147_v0 }
  0x3e   :  { %1728 = vmatmul.mubr.f32.vlgmr.msra.gmra.mxu0 %v63_v13  ;;  %1730 = vmatprep.subr.mxu0 %v2147_v0 }
  0x3f   :  { %1731 = vmatpush3.msra.mxu0 %v2217_v1  ;;  %1762 = vmatprep.mubr.msk.f32.mxu0 %vm2148_vm0, %v2147_v0 }
  0x40   :  { %1732 = vmatprep.subr.mxu0 %v2147_v0  ;;  %1786 = vmatpush3.msra.mxu1 %v2298_v21 }
  0x41   :  { %1733 = vmatpush3.msra.mxu0 %v2219_v2  ;;  %1787 = vmatprep.subr.mxu1 %v2147_v0 }
  0x42   :  { %1734 = vmatprep.subr.mxu0 %v2147_v0  ;;  %1788 = vmatpush3.msra.mxu1 %v2304_v22 }
  0x43   :  { %1735 = vmatpush3.msra.mxu0 %v2223_v3  ;;  %1789 = vmatprep.subr.mxu1 %v2147_v0 }
  0x44   :  { %1736 = vmatprep.subr.mxu0 %v2147_v0  ;;  %1790 = vmatpush3.msra.mxu1 %v2310_v23 }
  0x45   :  { %1737 = vmatpush3.msra.mxu0 %v2236_v7  ;;  %1791 = vmatprep.subr.mxu1 %v2147_v0 }
  0x46   :  { %1738 = vmatprep.subr.mxu0 %v2147_v0  ;;  %1792 = vmatpush3.msra.mxu1 %v2316_v24 }
  0x47   :  { %1739 = vmatpush3.msra.mxu0 %v2244_v9  ;;  %1793 = vmatprep.subr.mxu1 %v2147_v0 }
  0x48   :  { %1740 = vmatprep.subr.mxu0 %v2147_v0  ;;  %1794 = vmatpush3.msra.mxu1 %v2322_v25 }
  0x49   :  { %1741 = vmatpush3.msra.mxu0 %v2253_v11  ;;  %1795 = vmatprep.subr.mxu1 %v2147_v0 }
  0x4a   :  { %1742 = vmatprep.subr.mxu0 %v2147_v0  ;;  %1796 = vmatpush3.msra.mxu1 %v2328_v26 }
  0x4b   :  { %1743 = vmatpush3.msra.mxu0 %v2265_v14  ;;  %1797 = vmatprep.mubr.msk.f32.mxu1 %vm2148_vm0, %v2147_v0 }
  0x4c   :  { %1744 = vmatprep.subr.mxu0 %v2147_v0  ;;  %1835 = vmatprep.subr.mxu1 %v2147_v0 }
  0x4d   :  { %1745 = vmatpush3.msra.mxu0 %v2274_v16 }
  0x4e   :  { %1746 = vmatprep.subr.mxu0 %v2147_v0 }
  0x4f   :  { %1747 = vmatpush3.msra.mxu0 %v2283_v18 }
  0x50   :  { %1748 = vmatprep.subr.mxu0 %v2147_v0 }
  0x51   :  { %1749 = vmatpush3.msra.mxu0 %v2292_v20 }
  0x52   :  { %1750 = vmatprep.subr.mxu0 %v2147_v0 }
  0x53   :  { %1751 = vmatpush3.msra.mxu0 %v2298_v21 }
  0x54   :  { %1752 = vmatprep.subr.mxu0 %v2147_v0 }
  0x55   :  { %1753 = vmatpush3.msra.mxu0 %v2304_v22 }
  0x56   :  { %1754 = vmatprep.subr.mxu0 %v2147_v0 }
  0x57   :  { %1755 = vmatpush3.msra.mxu0 %v2310_v23 }
  0x58   :  { %1756 = vmatprep.subr.mxu0 %v2147_v0 }
  0x59   :  { %1757 = vmatpush3.msra.mxu0 %v2316_v24 }
  0x5a   :  { %1758 = vmatprep.subr.mxu0 %v2147_v0 }
  0x5b   :  { %1759 = vmatpush3.msra.mxu0 %v2322_v25 }
  0x5c   :  { %1760 = vmatprep.subr.mxu0 %v2147_v0 }
  0x5d   :  { %1761 = vmatpush3.msra.mxu0 %v2328_v26 }
  0x5e   :  { %1800 = vmatprep.subr.mxu0 %v2147_v0 }
  0xe2   :  { %v1685_v27 = vpop.f32.mrf.mxu1 }
  0xe3   :  { %v2391_v36 = vadd.f32 %v1685_v27, %v1501_v34 }
  0xe4   :  { %v176_v28 = vpop.f32.mrf.mxu1 }
  0xe5   :  { %v2393_v37 = vadd.f32 %v1501_v34, %v176_v28 }
  0xe6   :  { %v1688_v29 = vpop.f32.mrf.mxu1 }
  0xe7   :  { %v2395_v38 = vadd.f32 %v1688_v29, %v1501_v34 }
  0xe8   :  { %v186_v30 = vpop.f32.mrf.mxu1 }
  0xe9   :  { %v2397_v39 = vadd.f32 %v1501_v34, %v186_v30 }
  0xea   :  { %v1691_v31 = vpop.f32.mrf.mxu1 }
  0xeb   :  { %v2399_v40 = vadd.f32 %v1691_v31, %v1501_v34 }
  0xec   :  { %v196_v32 = vpop.f32.mrf.mxu1 }
  0xed   :  { %v2401_v41 = vadd.f32 %v1501_v34, %v196_v32 }
  0xee   :  { %v1694_v33 = vpop.f32.mrf.mxu1 }
  0xef   :  { %v2403_v42 = vadd.f32 %v1694_v33, %v1501_v34 }
  0xf0   :  { %v206_v35 = vpop.f32.mrf.mxu1 }
  0xf1   :  { %v2405_v43 = vadd.f32 %v1501_v34, %v206_v35 }
  0xfe   :  { %v298_v44 = vpop.f32.mrf.mxu0 }
  0xff   :  { %v303_v45 = vrot.slane %v298_v44, 1  ;;  %v304_v46 = vrot.slane %v298_v44, 2  ;;  %v305_v47 = vrot.slane %v298_v44, 3  ;;  %v318_v48 = vadd.f32 %v298_v44, %v2393_v37 }
 0x100   :  { %v1729_v49 = vpop.f32.mrf.mxu0  ;;  %v306_v50 = vrot.slane %v298_v44, 4  ;;  %v307_v51 = vrot.slane %v298_v44, 5  ;;  %v308_v52 = vrot.slane %v298_v44, 6  ;;  %v309_v53 = vrot.slane %v298_v44, 7 }
 0x101   :  { %v319_v54 = vadd.f32 %v303_v45, %v2391_v36  ;;  %v326_v55 = vmax.f32 %v318_v48, 0.0  ;;  %v320_v56 = vadd.f32 %v304_v46, %v2397_v39  ;;  %v321_v57 = vadd.f32 %v305_v47, %v2395_v38 }
 0x102   :  { %v322_v58 = vadd.f32 %v306_v50, %v2401_v41  ;;  %v323_v59 = vadd.f32 %v307_v51, %v2399_v40  ;;  %v324_v60 = vadd.f32 %v308_v52, %v2405_v43  ;;  %v325_v61 = vadd.f32 %v309_v53, %v2403_v42 }
 0x103   :  { %v327_v62 = vmax.f32 %v319_v54, 0.0  ;;  %334 = vst [vmem:[#allocation8] sm:$0x1] %v326_v55  ;;  %v328_v63 = vmax.f32 %v320_v56, 0.0  ;;  %v329_v4 = vmax.f32 %v321_v57, 0.0 }
 0x104   :  { %v330_v5 = vmax.f32 %v322_v58, 0.0  ;;  %v331_v6 = vmax.f32 %v323_v59, 0.0  ;;  %v332_v8 = vmax.f32 %v324_v60, 0.0  ;;  %v333_v10 = vmax.f32 %v325_v61, 0.0 }
 0x105   :  { %335 = vst [vmem:[#allocation8 + $0x8] sm:$0x1] %v327_v62  ;;  %336 = vst [vmem:[#allocation8 + $0x10] sm:$0x1] %v328_v63  ;;  %v350_v12 = vrot.slane %v327_v62, 7  ;;  %v353_v13 = vrot.slane %v328_v63, 6 }
 0x106   :  { %337 = vst [vmem:[#allocation8 + $0x18] sm:$0x1] %v329_v4  ;;  %338 = vst [vmem:[#allocation8 + $0x20] sm:$0x1] %v330_v5  ;;  %v356_v17 = vrot.slane %v329_v4, 5  ;;  %v359_v27 = vrot.slane %v330_v5, 4 }
 0x107   :  { %339 = vst [vmem:[#allocation8 + $0x28] sm:$0x1] %v331_v6  ;;  %340 = vst [vmem:[#allocation8 + $0x30] sm:$0x1] %v332_v8  ;;  %v352_v15 = vsel %vm351_vm3, %v350_v12, %v326_v55  ;;  %v362_v29 = vrot.slane %v331_v6, 3  ;;  %v365_v31 = vrot.slane %v332_v8, 2 }
 0x108   :  { %341 = vst [vmem:[#allocation8 + $0x38] sm:$0x1] %v333_v10  ;;  %v355_v19 = vsel %vm354_vm4, %v353_v13, %v352_v15  ;;  %v368_v33 = vrot.slane %v333_v10, 1 }
 0x109   :  { %v358_v28 = vsel %vm357_vm5, %v356_v17, %v355_v19 }
 0x10a   :  { %v361_v30 = vsel %vm360_vm6, %v359_v27, %v358_v28 }
 0x10b   :  { %v364_v32 = vsel %vm363_vm7, %v362_v29, %v361_v30 }
 0x10c   :  { %v367_v34 = vsel %vm366_vm8, %v365_v31, %v364_v32 }
 0x10d   :  { %v370_v35 = vsel %vm369_vm9, %v368_v33, %v367_v34 }
 0x10e   :  { %1763 = vmatmul.mubr.f32.vlgmr.msra.gmra.mxu0 %v370_v35 }
 0x10f   :  { %1801 = vmatpush3.msra.mxu0 %v2217_v1  ;;  %1832 = vmatprep.mubr.msk.f32.mxu0 %vm2148_vm0, %v2147_v0 }
 0x110   :  { %1802 = vmatprep.subr.mxu0 %v2147_v0 }
 0x111   :  { %1803 = vmatpush3.msra.mxu0 %v2219_v2 }
 0x112   :  { %1804 = vmatprep.subr.mxu0 %v2147_v0 }
 0x113   :  { %1805 = vmatpush3.msra.mxu0 %v2223_v3 }
 0x114   :  { %1806 = vmatprep.subr.mxu0 %v2147_v0 }
 0x115   :  { %1807 = vmatpush3.msra.mxu0 %v2236_v7 }
 0x116   :  { %1808 = vmatprep.subr.mxu0 %v2147_v0 }
 0x117   :  { %1809 = vmatpush3.msra.mxu0 %v2244_v9 }
 0x118   :  { %1810 = vmatprep.subr.mxu0 %v2147_v0 }
 0x119   :  { %1811 = vmatpush3.msra.mxu0 %v2253_v11 }
 0x11a   :  { %1812 = vmatprep.subr.mxu0 %v2147_v0 }
 0x11b   :  { %1813 = vmatpush3.msra.mxu0 %v2265_v14 }
 0x11c   :  { %1814 = vmatprep.subr.mxu0 %v2147_v0 }
 0x11d   :  { %1815 = vmatpush3.msra.mxu0 %v2274_v16 }
 0x11e   :  { %1816 = vmatprep.subr.mxu0 %v2147_v0 }
 0x11f   :  { %1817 = vmatpush3.msra.mxu0 %v2283_v18 }
 0x120   :  { %1818 = vmatprep.subr.mxu0 %v2147_v0 }
 0x121   :  { %1819 = vmatpush3.msra.mxu0 %v2292_v20 }
 0x122   :  { %1820 = vmatprep.subr.mxu0 %v2147_v0 }
 0x123   :  { %1821 = vmatpush3.msra.mxu0 %v2298_v21 }
 0x124   :  { %1822 = vmatprep.subr.mxu0 %v2147_v0 }
 0x125   :  { %1823 = vmatpush3.msra.mxu0 %v2304_v22 }
 0x126   :  { %1824 = vmatprep.subr.mxu0 %v2147_v0 }
 0x127   :  { %1825 = vmatpush3.msra.mxu0 %v2310_v23 }
 0x128   :  { %1826 = vmatprep.subr.mxu0 %v2147_v0 }
 0x129   :  { %1827 = vmatpush3.msra.mxu0 %v2316_v24 }
 0x12a   :  { %1828 = vmatprep.subr.mxu0 %v2147_v0 }
 0x12b   :  { %1829 = vmatpush3.msra.mxu0 %v2322_v25 }
 0x12c   :  { %1830 = vmatprep.subr.mxu0 %v2147_v0 }
 0x12d   :  { %1831 = vmatpush3.msra.mxu0 %v2328_v26 }
 0x12e   :  { %1870 = vmatprep.subr.mxu0 %v2147_v0 }
 0x1ce   :  { %v438_v44 = vpop.f32.mrf.mxu0 }
 0x1cf   :  { %v443_v45 = vrot.slane %v438_v44, 7  ;;  %v444_v46 = vrot.slane %v438_v44, 1  ;;  %v445_v47 = vrot.slane %v438_v44, 2  ;;  %v446_v48 = vrot.slane %v438_v44, 3 }
 0x1d0   :  { %v459_v49 = vadd.f32 %v438_v44, %v2391_v36  ;;  %v1764_v50 = vpop.f32.mrf.mxu0  ;;  %v447_v51 = vrot.slane %v438_v44, 4  ;;  %v448_v52 = vrot.slane %v438_v44, 5  ;;  %v449_v53 = vrot.slane %v438_v44, 6 }
 0x1d1   :  { %v458_v54 = vadd.f32 %v443_v45, %v2393_v37  ;;  %v460_v55 = vadd.f32 %v444_v46, %v2397_v39  ;;  %v461_v56 = vadd.f32 %v445_v47, %v2395_v38  ;;  %v462_v57 = vadd.f32 %v446_v48, %v2401_v41 }
 0x1d2   :  { %v467_v58 = vmax.f32 %v459_v49, 0.0  ;;  %v463_v59 = vadd.f32 %v447_v51, %v2399_v40  ;;  %v464_v60 = vadd.f32 %v448_v52, %v2405_v43  ;;  %v465_v61 = vadd.f32 %v449_v53, %v2403_v42 }
 0x1d3   :  { %v466_v62 = vmax.f32 %v458_v54, 0.0  ;;  %v468_v63 = vmax.f32 %v460_v55, 0.0  ;;  %v469_v4 = vmax.f32 %v461_v56, 0.0  ;;  %v470_v5 = vmax.f32 %v462_v57, 0.0 }
 0x1d4   :  { %475 = vst [vmem:[#allocation8 + $0x8] sm:$0x2] %v467_v58  ;;  %v471_v6 = vmax.f32 %v463_v59, 0.0  ;;  %v472_v8 = vmax.f32 %v464_v60, 0.0  ;;  %v473_v10 = vmax.f32 %v465_v61, 0.0 }
 0x1d5   :  { %474 = vst [vmem:[#allocation8] sm:$0x2] %v466_v62  ;;  %476 = vst [vmem:[#allocation8 + $0x10] sm:$0x2] %v468_v63  ;;  %v490_v12 = vrot.slane %v466_v62, 1  ;;  %v492_v13 = vrot.slane %v468_v63, 7 }
 0x1d6   :  { %477 = vst [vmem:[#allocation8 + $0x18] sm:$0x2] %v469_v4  ;;  %478 = vst [vmem:[#allocation8 + $0x20] sm:$0x2] %v470_v5  ;;  %v494_v17 = vrot.slane %v469_v4, 6  ;;  %v496_v27 = vrot.slane %v470_v5, 5 }
 0x1d7   :  { %479 = vst [vmem:[#allocation8 + $0x28] sm:$0x2] %v471_v6  ;;  %480 = vst [vmem:[#allocation8 + $0x30] sm:$0x2] %v472_v8  ;;  %v491_v15 = vsel %vm351_vm3, %v467_v58, %v490_v12  ;;  %v498_v29 = vrot.slane %v471_v6, 4  ;;  %v500_v31 = vrot.slane %v472_v8, 3 }
 0x1d8   :  { %481 = vst [vmem:[#allocation8 + $0x38] sm:$0x2] %v473_v10  ;;  %v493_v19 = vsel %vm354_vm4, %v492_v13, %v491_v15  ;;  %v502_v33 = vrot.slane %v473_v10, 2 }
 0x1d9   :  { %v495_v28 = vsel %vm357_vm5, %v494_v17, %v493_v19 }
 0x1da   :  { %v497_v30 = vsel %vm360_vm6, %v496_v27, %v495_v28 }
 0x1db   :  { %v499_v32 = vsel %vm363_vm7, %v498_v29, %v497_v30 }
 0x1dc   :  { %v501_v34 = vsel %vm366_vm8, %v500_v31, %v499_v32 }
 0x1dd   :  { %v503_v35 = vsel %vm369_vm9, %v502_v33, %v501_v34 }
 0x1de   :  { %1798 = vmatmul.mubr.f32.vlgmr.msra.gmra.mxu1 %v503_v35 }
 0x1df   :  { %1836 = vmatpush3.msra.mxu1 %v2217_v1  ;;  %1867 = vmatprep.mubr.msk.f32.mxu1 %vm2148_vm0, %v2147_v0 }
 0x1e0   :  { %1837 = vmatprep.subr.mxu1 %v2147_v0 }
 0x1e1   :  { %1838 = vmatpush3.msra.mxu1 %v2219_v2 }
 0x1e2   :  { %1839 = vmatprep.subr.mxu1 %v2147_v0 }
 0x1e3   :  { %1840 = vmatpush3.msra.mxu1 %v2223_v3 }
 0x1e4   :  { %1841 = vmatprep.subr.mxu1 %v2147_v0 }
 0x1e5   :  { %1842 = vmatpush3.msra.mxu1 %v2236_v7 }
 0x1e6   :  { %1843 = vmatprep.subr.mxu1 %v2147_v0 }
 0x1e7   :  { %1844 = vmatpush3.msra.mxu1 %v2244_v9 }
 0x1e8   :  { %1845 = vmatprep.subr.mxu1 %v2147_v0 }
 0x1e9   :  { %1846 = vmatpush3.msra.mxu1 %v2253_v11 }
 0x1ea   :  { %1847 = vmatprep.subr.mxu1 %v2147_v0 }
 0x1eb   :  { %1848 = vmatpush3.msra.mxu1 %v2265_v14 }
 0x1ec   :  { %1849 = vmatprep.subr.mxu1 %v2147_v0 }
 0x1ed   :  { %1850 = vmatpush3.msra.mxu1 %v2274_v16 }
 0x1ee   :  { %1851 = vmatprep.subr.mxu1 %v2147_v0 }
 0x1ef   :  { %1852 = vmatpush3.msra.mxu1 %v2283_v18 }
 0x1f0   :  { %1853 = vmatprep.subr.mxu1 %v2147_v0 }
 0x1f1   :  { %1854 = vmatpush3.msra.mxu1 %v2292_v20 }
 0x1f2   :  { %1855 = vmatprep.subr.mxu1 %v2147_v0 }
 0x1f3   :  { %1856 = vmatpush3.msra.mxu1 %v2298_v21 }
 0x1f4   :  { %1857 = vmatprep.subr.mxu1 %v2147_v0 }
 0x1f5   :  { %1858 = vmatpush3.msra.mxu1 %v2304_v22 }
 0x1f6   :  { %1859 = vmatprep.subr.mxu1 %v2147_v0 }
 0x1f7   :  { %1860 = vmatpush3.msra.mxu1 %v2310_v23 }
 0x1f8   :  { %1861 = vmatprep.subr.mxu1 %v2147_v0 }
 0x1f9   :  { %1862 = vmatpush3.msra.mxu1 %v2316_v24 }
 0x1fa   :  { %1863 = vmatprep.subr.mxu1 %v2147_v0 }
 0x1fb   :  { %1864 = vmatpush3.msra.mxu1 %v2322_v25 }
 0x1fc   :  { %1865 = vmatprep.subr.mxu1 %v2147_v0 }
 0x1fd   :  { %1866 = vmatpush3.msra.mxu1 %v2328_v26 }
 0x1fe   :  { %1905 = vmatprep.subr.mxu1 %v2147_v0 }
 0x29e   :  { %v571_v44 = vpop.f32.mrf.mxu1 }
 0x29f   :  { %v576_v45 = vrot.slane %v571_v44, 6  ;;  %v577_v46 = vrot.slane %v571_v44, 7  ;;  %v578_v47 = vrot.slane %v571_v44, 1  ;;  %v579_v48 = vrot.slane %v571_v44, 2 }
 0x2a0   :  { %v1799_v49 = vpop.f32.mrf.mxu1  ;;  %v580_v50 = vrot.slane %v571_v44, 3  ;;  %v581_v51 = vrot.slane %v571_v44, 4  ;;  %v582_v52 = vrot.slane %v571_v44, 5  ;;  %v593_v53 = vadd.f32 %v571_v44, %v2397_v39 }
 0x2a1   :  { %v591_v54 = vadd.f32 %v576_v45, %v2393_v37  ;;  %v592_v55 = vadd.f32 %v577_v46, %v2391_v36  ;;  %v594_v56 = vadd.f32 %v578_v47, %v2395_v38  ;;  %v595_v57 = vadd.f32 %v579_v48, %v2401_v41 }
 0x2a2   :  { %v596_v58 = vadd.f32 %v580_v50, %v2399_v40  ;;  %v597_v59 = vadd.f32 %v581_v51, %v2405_v43  ;;  %v598_v60 = vadd.f32 %v582_v52, %v2403_v42  ;;  %v601_v61 = vmax.f32 %v593_v53, 0.0 }
 0x2a3   :  { %v599_v62 = vmax.f32 %v591_v54, 0.0  ;;  %v600_v63 = vmax.f32 %v592_v55, 0.0  ;;  %v602_v4 = vmax.f32 %v594_v56, 0.0  ;;  %v603_v5 = vmax.f32 %v595_v57, 0.0 }
 0x2a4   :  { %v604_v6 = vmax.f32 %v596_v58, 0.0  ;;  %v605_v8 = vmax.f32 %v597_v59, 0.0  ;;  %v606_v10 = vmax.f32 %v598_v60, 0.0  ;;  %609 = vst [vmem:[#allocation8 + $0x10] sm:$0x4] %v601_v61 }
 0x2a5   :  { %607 = vst [vmem:[#allocation8] sm:$0x4] %v599_v62  ;;  %608 = vst [vmem:[#allocation8 + $0x8] sm:$0x4] %v600_v63  ;;  %v623_v12 = vrot.slane %v599_v62, 2  ;;  %v624_v13 = vrot.slane %v600_v63, 1 }
 0x2a6   :  { %610 = vst [vmem:[#allocation8 + $0x18] sm:$0x4] %v602_v4  ;;  %611 = vst [vmem:[#allocation8 + $0x20] sm:$0x4] %v603_v5  ;;  %v627_v17 = vrot.slane %v602_v4, 7  ;;  %v629_v27 = vrot.slane %v603_v5, 6 }
 0x2a7   :  { %612 = vst [vmem:[#allocation8 + $0x28] sm:$0x4] %v604_v6  ;;  %613 = vst [vmem:[#allocation8 + $0x30] sm:$0x4] %v605_v8  ;;  %v625_v15 = vsel %vm351_vm3, %v624_v13, %v623_v12  ;;  %v631_v29 = vrot.slane %v604_v6, 5  ;;  %v633_v31 = vrot.slane %v605_v8, 4 }
 0x2a8   :  { %614 = vst [vmem:[#allocation8 + $0x38] sm:$0x4] %v606_v10  ;;  %v626_v19 = vsel %vm354_vm4, %v601_v61, %v625_v15  ;;  %v635_v33 = vrot.slane %v606_v10, 3 }
 0x2a9   :  { %v628_v28 = vsel %vm357_vm5, %v627_v17, %v626_v19 }
 0x2aa   :  { %v630_v30 = vsel %vm360_vm6, %v629_v27, %v628_v28 }
 0x2ab   :  { %v632_v32 = vsel %vm363_vm7, %v631_v29, %v630_v30 }
 0x2ac   :  { %v634_v34 = vsel %vm366_vm8, %v633_v31, %v632_v32 }
 0x2ad   :  { %v636_v35 = vsel %vm369_vm9, %v635_v33, %v634_v34 }
 0x2ae   :  { %1833 = vmatmul.mubr.f32.vlgmr.msra.gmra.mxu0 %v636_v35 }
 0x2af   :  { %1871 = vmatpush3.msra.mxu0 %v2217_v1  ;;  %1902 = vmatprep.mubr.msk.f32.mxu0 %vm2148_vm0, %v2147_v0 }
 0x2b0   :  { %1872 = vmatprep.subr.mxu0 %v2147_v0 }
 0x2b1   :  { %1873 = vmatpush3.msra.mxu0 %v2219_v2 }
 0x2b2   :  { %1874 = vmatprep.subr.mxu0 %v2147_v0 }
 0x2b3   :  { %1875 = vmatpush3.msra.mxu0 %v2223_v3 }
 0x2b4   :  { %1876 = vmatprep.subr.mxu0 %v2147_v0 }
 0x2b5   :  { %1877 = vmatpush3.msra.mxu0 %v2236_v7 }
 0x2b6   :  { %1878 = vmatprep.subr.mxu0 %v2147_v0 }
 0x2b7   :  { %1879 = vmatpush3.msra.mxu0 %v2244_v9 }
 0x2b8   :  { %1880 = vmatprep.subr.mxu0 %v2147_v0 }
 0x2b9   :  { %1881 = vmatpush3.msra.mxu0 %v2253_v11 }
 0x2ba   :  { %1882 = vmatprep.subr.mxu0 %v2147_v0 }
 0x2bb   :  { %1883 = vmatpush3.msra.mxu0 %v2265_v14 }
 0x2bc   :  { %1884 = vmatprep.subr.mxu0 %v2147_v0 }
 0x2bd   :  { %1885 = vmatpush3.msra.mxu0 %v2274_v16 }
 0x2be   :  { %1886 = vmatprep.subr.mxu0 %v2147_v0 }
 0x2bf   :  { %1887 = vmatpush3.msra.mxu0 %v2283_v18 }
 0x2c0   :  { %1888 = vmatprep.subr.mxu0 %v2147_v0 }
 0x2c1   :  { %1889 = vmatpush3.msra.mxu0 %v2292_v20 }
 0x2c2   :  { %1890 = vmatprep.subr.mxu0 %v2147_v0 }
 0x2c3   :  { %1891 = vmatpush3.msra.mxu0 %v2298_v21 }
 0x2c4   :  { %1892 = vmatprep.subr.mxu0 %v2147_v0 }
 0x2c5   :  { %1893 = vmatpush3.msra.mxu0 %v2304_v22 }
 0x2c6   :  { %1894 = vmatprep.subr.mxu0 %v2147_v0 }
 0x2c7   :  { %1895 = vmatpush3.msra.mxu0 %v2310_v23 }
 0x2c8   :  { %1896 = vmatprep.subr.mxu0 %v2147_v0 }
 0x2c9   :  { %1897 = vmatpush3.msra.mxu0 %v2316_v24 }
 0x2ca   :  { %1898 = vmatprep.subr.mxu0 %v2147_v0 }
 0x2cb   :  { %1899 = vmatpush3.msra.mxu0 %v2322_v25 }
 0x2cc   :  { %1900 = vmatprep.subr.mxu0 %v2147_v0 }
 0x2cd   :  { %1901 = vmatpush3.msra.mxu0 %v2328_v26 }
 0x2ce   :  { %1940 = vmatprep.subr.mxu0 %v2147_v0 }
 0x36e   :  { %v704_v44 = vpop.f32.mrf.mxu0 }
 0x36f   :  { %v709_v45 = vrot.slane %v704_v44, 5  ;;  %v710_v46 = vrot.slane %v704_v44, 6  ;;  %v711_v47 = vrot.slane %v704_v44, 7  ;;  %v712_v48 = vrot.slane %v704_v44, 1 }
 0x370   :  { %v1834_v49 = vpop.f32.mrf.mxu0  ;;  %v713_v50 = vrot.slane %v704_v44, 2  ;;  %v714_v51 = vrot.slane %v704_v44, 3  ;;  %v715_v52 = vrot.slane %v704_v44, 4  ;;  %v727_v53 = vadd.f32 %v704_v44, %v2395_v38 }
 0x371   :  { %v724_v54 = vadd.f32 %v709_v45, %v2393_v37  ;;  %v725_v55 = vadd.f32 %v710_v46, %v2391_v36  ;;  %v726_v56 = vadd.f32 %v711_v47, %v2397_v39  ;;  %v728_v57 = vadd.f32 %v712_v48, %v2401_v41 }
 0x372   :  { %v729_v58 = vadd.f32 %v713_v50, %v2399_v40  ;;  %v730_v59 = vadd.f32 %v714_v51, %v2405_v43  ;;  %v731_v60 = vadd.f32 %v715_v52, %v2403_v42  ;;  %v735_v61 = vmax.f32 %v727_v53, 0.0 }
 0x373   :  { %v732_v62 = vmax.f32 %v724_v54, 0.0  ;;  %v733_v63 = vmax.f32 %v725_v55, 0.0  ;;  %v734_v4 = vmax.f32 %v726_v56, 0.0  ;;  %v736_v5 = vmax.f32 %v728_v57, 0.0 }
 0x374   :  { %v737_v6 = vmax.f32 %v729_v58, 0.0  ;;  %v738_v8 = vmax.f32 %v730_v59, 0.0  ;;  %v739_v10 = vmax.f32 %v731_v60, 0.0  ;;  %743 = vst [vmem:[#allocation8 + $0x18] sm:$0x8] %v735_v61 }
 0x375   :  { %740 = vst [vmem:[#allocation8] sm:$0x8] %v732_v62  ;;  %741 = vst [vmem:[#allocation8 + $0x8] sm:$0x8] %v733_v63  ;;  %v756_v12 = vrot.slane %v732_v62, 3  ;;  %v757_v13 = vrot.slane %v733_v63, 2 }
 0x376   :  { %742 = vst [vmem:[#allocation8 + $0x10] sm:$0x8] %v734_v4  ;;  %744 = vst [vmem:[#allocation8 + $0x20] sm:$0x8] %v736_v5  ;;  %v759_v15 = vrot.slane %v734_v4, 1  ;;  %v762_v27 = vrot.slane %v736_v5, 7 }
 0x377   :  { %745 = vst [vmem:[#allocation8 + $0x28] sm:$0x8] %v737_v6  ;;  %746 = vst [vmem:[#allocation8 + $0x30] sm:$0x8] %v738_v8  ;;  %v758_v17 = vsel %vm351_vm3, %v757_v13, %v756_v12  ;;  %v764_v29 = vrot.slane %v737_v6, 6  ;;  %v766_v31 = vrot.slane %v738_v8, 5 }
 0x378   :  { %747 = vst [vmem:[#allocation8 + $0x38] sm:$0x8] %v739_v10  ;;  %v760_v19 = vsel %vm354_vm4, %v759_v15, %v758_v17  ;;  %v768_v33 = vrot.slane %v739_v10, 4 }
 0x379   :  { %v761_v28 = vsel %vm357_vm5, %v735_v61, %v760_v19 }
 0x37a   :  { %v763_v30 = vsel %vm360_vm6, %v762_v27, %v761_v28 }
 0x37b   :  { %v765_v32 = vsel %vm363_vm7, %v764_v29, %v763_v30  ;;  %v2028_v29 = vld [vmem:[#allocation3 + $0x78] sm:$0xff]  ;;  %v2029_v30 = vld [vmem:[#allocation3 + $0x70] sm:$0xff] }
 0x37c   :  { %v767_v34 = vsel %vm366_vm8, %v766_v31, %v765_v32  ;;  %v2030_v31 = vld [vmem:[#allocation3 + $0x68] sm:$0xff]  ;;  %v2031_v32 = vld [vmem:[#allocation3 + $0x60] sm:$0xff] }
 0x37d   :  { %v769_v35 = vsel %vm369_vm9, %v768_v33, %v767_v34  ;;  %v2032_v33 = vld [vmem:[#allocation3 + $0x58] sm:$0xff]  ;;  %v2033_v34 = vld [vmem:[#allocation3 + $0x50] sm:$0xff] }
 0x37e   :  { %1868 = vmatmul.mubr.f32.vlgmr.msra.gmra.mxu1 %v769_v35  ;;  %v2034_v35 = vld [vmem:[#allocation3 + $0x48] sm:$0xff] }
 0x37f   :  { %1906 = vmatpush3.msra.mxu1 %v2217_v1  ;;  %1937 = vmatprep.mubr.msk.f32.mxu1 %vm2148_vm0, %v2147_v0 }
 0x380   :  { %1907 = vmatprep.subr.mxu1 %v2147_v0 }
 0x381   :  { %1908 = vmatpush3.msra.mxu1 %v2219_v2 }
 0x382   :  { %1909 = vmatprep.subr.mxu1 %v2147_v0 }
 0x383   :  { %1910 = vmatpush3.msra.mxu1 %v2223_v3 }
 0x384   :  { %1911 = vmatprep.subr.mxu1 %v2147_v0 }
 0x385   :  { %1912 = vmatpush3.msra.mxu1 %v2236_v7 }
 0x386   :  { %1913 = vmatprep.subr.mxu1 %v2147_v0 }
 0x387   :  { %1914 = vmatpush3.msra.mxu1 %v2244_v9 }
 0x388   :  { %1915 = vmatprep.subr.mxu1 %v2147_v0 }
 0x389   :  { %1916 = vmatpush3.msra.mxu1 %v2253_v11 }
 0x38a   :  { %1917 = vmatprep.subr.mxu1 %v2147_v0 }
 0x38b   :  { %1918 = vmatpush3.msra.mxu1 %v2265_v14 }
 0x38c   :  { %1919 = vmatprep.subr.mxu1 %v2147_v0 }
 0x38d   :  { %1920 = vmatpush3.msra.mxu1 %v2274_v16 }
 0x38e   :  { %1921 = vmatprep.subr.mxu1 %v2147_v0 }
 0x38f   :  { %1922 = vmatpush3.msra.mxu1 %v2283_v18 }
 0x390   :  { %1923 = vmatprep.subr.mxu1 %v2147_v0 }
 0x391   :  { %1924 = vmatpush3.msra.mxu1 %v2292_v20 }
 0x392   :  { %1925 = vmatprep.subr.mxu1 %v2147_v0 }
 0x393   :  { %1926 = vmatpush3.msra.mxu1 %v2298_v21 }
 0x394   :  { %1927 = vmatprep.subr.mxu1 %v2147_v0 }
 0x395   :  { %1928 = vmatpush3.msra.mxu1 %v2304_v22 }
 0x396   :  { %1929 = vmatprep.subr.mxu1 %v2147_v0 }
 0x397   :  { %1930 = vmatpush3.msra.mxu1 %v2310_v23 }
 0x398   :  { %1931 = vmatprep.subr.mxu1 %v2147_v0 }
 0x399   :  { %1932 = vmatpush3.msra.mxu1 %v2316_v24 }
 0x39a   :  { %1933 = vmatprep.subr.mxu1 %v2147_v0 }
 0x39b   :  { %1934 = vmatpush3.msra.mxu1 %v2322_v25 }
 0x39c   :  { %1935 = vmatprep.subr.mxu1 %v2147_v0 }
 0x39d   :  { %1936 = vmatpush3.msra.mxu1 %v2328_v26 }
 0x43e   :  { %v837_v1 = vpop.f32.mrf.mxu1 }
 0x43f   :  { %v842_v2 = vrot.slane %v837_v1, 4  ;;  %v843_v3 = vrot.slane %v837_v1, 5  ;;  %v844_v7 = vrot.slane %v837_v1, 6  ;;  %v845_v9 = vrot.slane %v837_v1, 7 }
 0x440   :  { %v1869_v11 = vpop.f32.mrf.mxu1  ;;  %v846_v14 = vrot.slane %v837_v1, 1  ;;  %v847_v44 = vrot.slane %v837_v1, 2  ;;  %v848_v45 = vrot.slane %v837_v1, 3  ;;  %v861_v46 = vadd.f32 %v837_v1, %v2401_v41 }
 0x441   :  { %v857_v47 = vadd.f32 %v842_v2, %v2393_v37  ;;  %v858_v48 = vadd.f32 %v843_v3, %v2391_v36  ;;  %v859_v49 = vadd.f32 %v844_v7, %v2397_v39  ;;  %v860_v50 = vadd.f32 %v845_v9, %v2395_v38 }
 0x442   :  { %v862_v51 = vadd.f32 %v846_v14, %v2399_v40  ;;  %v863_v52 = vadd.f32 %v847_v44, %v2405_v43  ;;  %v864_v53 = vadd.f32 %v848_v45, %v2403_v42  ;;  %v869_v54 = vmax.f32 %v861_v46, 0.0 }
 0x443   :  { %v865_v55 = vmax.f32 %v857_v47, 0.0  ;;  %v866_v56 = vmax.f32 %v858_v48, 0.0  ;;  %v867_v57 = vmax.f32 %v859_v49, 0.0  ;;  %v868_v58 = vmax.f32 %v860_v50, 0.0 }
 0x444   :  { %v870_v59 = vmax.f32 %v862_v51, 0.0  ;;  %v871_v60 = vmax.f32 %v863_v52, 0.0  ;;  %v872_v61 = vmax.f32 %v864_v53, 0.0  ;;  %877 = vst [vmem:[#allocation8 + $0x20] sm:$0x10] %v869_v54 }
 0x445   :  { %873 = vst [vmem:[#allocation8] sm:$0x10] %v865_v55  ;;  %874 = vst [vmem:[#allocation8 + $0x8] sm:$0x10] %v866_v56  ;;  %v889_v62 = vrot.slane %v865_v55, 4  ;;  %v890_v63 = vrot.slane %v866_v56, 3 }
 0x446   :  { %875 = vst [vmem:[#allocation8 + $0x10] sm:$0x10] %v867_v57  ;;  %876 = vst [vmem:[#allocation8 + $0x18] sm:$0x10] %v868_v58  ;;  %v892_v4 = vrot.slane %v867_v57, 2  ;;  %v894_v6 = vrot.slane %v868_v58, 1 }
 0x447   :  { %878 = vst [vmem:[#allocation8 + $0x28] sm:$0x10] %v870_v59  ;;  %879 = vst [vmem:[#allocation8 + $0x30] sm:$0x10] %v871_v60  ;;  %v891_v5 = vsel %vm351_vm3, %v890_v63, %v889_v62  ;;  %v897_v12 = vrot.slane %v870_v59, 7  ;;  %v899_v15 = vrot.slane %v871_v60, 6 }
 0x448   :  { %880 = vst [vmem:[#allocation8 + $0x38] sm:$0x10] %v872_v61  ;;  %v893_v8 = vsel %vm354_vm4, %v892_v4, %v891_v5  ;;  %v901_v19 = vrot.slane %v872_v61, 5 }
 0x449   :  { %v895_v10 = vsel %vm357_vm5, %v894_v6, %v893_v8  ;;  %v1328_v6 = vld [vmem:[#allocation6 + $0x78] sm:$0xff]  ;;  %v1327_v8 = vld [vmem:[#allocation6 + $0x70] sm:$0xff] }
 0x44a   :  { %v896_v13 = vsel %vm360_vm6, %v869_v54, %v895_v10  ;;  %1975 = vmatprep.subr.mxu1 %v1328_v6  ;;  %v1326_v10 = vld [vmem:[#allocation6 + $0x68] sm:$0xff] }
 0x44b   :  { %v898_v17 = vsel %vm363_vm7, %v897_v12, %v896_v13  ;;  %v1325_v12 = vld [vmem:[#allocation6 + $0x60] sm:$0xff]  ;;  %v1324_v13 = vld [vmem:[#allocation6 + $0x58] sm:$0xff] }
 0x44c   :  { %v900_v27 = vsel %vm366_vm8, %v899_v15, %v898_v17  ;;  %v1323_v15 = vld [vmem:[#allocation6 + $0x50] sm:$0xff]  ;;  %v1322_v17 = vld [vmem:[#allocation6 + $0x48] sm:$0xff] }
 0x44d   :  { %v902_v28 = vsel %vm369_vm9, %v901_v19, %v900_v27  ;;  %v1321_v19 = vld [vmem:[#allocation6 + $0x40] sm:$0xff] }
 0x44e   :  { %1903 = vmatmul.mubr.f32.vlgmr.msra.gmra.mxu0 %v902_v28 }
 0x44f   :  { %1941 = vmatpush3.msra.mxu0 %v2028_v29  ;;  %1972 = vmatprep.mubr.msk.f32.mxu0 %vm2148_vm0, %v2147_v0 }
 0x450   :  { %1942 = vmatprep.subr.mxu0 %v2147_v0 }
 0x451   :  { %1943 = vmatpush3.msra.mxu0 %v2029_v30 }
 0x452   :  { %1944 = vmatprep.subr.mxu0 %v2147_v0 }
 0x453   :  { %1945 = vmatpush3.msra.mxu0 %v2030_v31 }
 0x454   :  { %1946 = vmatprep.subr.mxu0 %v2147_v0 }
 0x455   :  { %1947 = vmatpush3.msra.mxu0 %v2031_v32 }
 0x456   :  { %1948 = vmatprep.subr.mxu0 %v2147_v0 }
 0x457   :  { %1949 = vmatpush3.msra.mxu0 %v2032_v33 }
 0x458   :  { %1950 = vmatprep.subr.mxu0 %v2147_v0 }
 0x459   :  { %1951 = vmatpush3.msra.mxu0 %v2033_v34 }
 0x45a   :  { %1952 = vmatprep.subr.mxu0 %v2147_v0 }
 0x45b   :  { %1953 = vmatpush3.msra.mxu0 %v2034_v35 }
 0x45c   :  { %1954 = vmatprep.subr.mxu0 %v2147_v0 }
 0x45d   :  { %1955 = vmatpush3.msra.mxu0 %v2274_v16 }
 0x45e   :  { %1956 = vmatprep.subr.mxu0 %v2147_v0 }
 0x45f   :  { %1957 = vmatpush3.msra.mxu0 %v2283_v18 }
 0x460   :  { %1958 = vmatprep.subr.mxu0 %v2147_v0 }
 0x461   :  { %1959 = vmatpush3.msra.mxu0 %v2292_v20 }
 0x462   :  { %1960 = vmatprep.subr.mxu0 %v2147_v0 }
 0x463   :  { %1961 = vmatpush3.msra.mxu0 %v2298_v21 }
 0x464   :  { %1962 = vmatprep.subr.mxu0 %v2147_v0 }
 0x465   :  { %1963 = vmatpush3.msra.mxu0 %v2304_v22 }
 0x466   :  { %1964 = vmatprep.subr.mxu0 %v2147_v0 }
 0x467   :  { %1965 = vmatpush3.msra.mxu0 %v2310_v23 }
 0x468   :  { %1966 = vmatprep.subr.mxu0 %v2147_v0 }
 0x469   :  { %1967 = vmatpush3.msra.mxu0 %v2316_v24 }
 0x46a   :  { %1968 = vmatprep.subr.mxu0 %v2147_v0 }
 0x46b   :  { %1969 = vmatpush3.msra.mxu0 %v2322_v25 }
 0x46c   :  { %1970 = vmatprep.subr.mxu0 %v2147_v0 }
 0x46d   :  { %1971 = vmatpush3.msra.mxu0 %v2328_v26 }
 0x50e   :  { %v970_v16 = vpop.f32.mrf.mxu0 }
 0x50f   :  { %v975_v18 = vrot.slane %v970_v16, 3  ;;  %v976_v20 = vrot.slane %v970_v16, 4  ;;  %v977_v21 = vrot.slane %v970_v16, 5  ;;  %v978_v22 = vrot.slane %v970_v16, 6 }
 0x510   :  { %v1904_v1 = vpop.f32.mrf.mxu0  ;;  %v979_v2 = vrot.slane %v970_v16, 7  ;;  %v980_v23 = vrot.slane %v970_v16, 1  ;;  %v981_v3 = vrot.slane %v970_v16, 2  ;;  %v995_v7 = vadd.f32 %v970_v16, %v2399_v40 }
 0x511   :  { %v990_v24 = vadd.f32 %v975_v18, %v2393_v37  ;;  %v991_v9 = vadd.f32 %v976_v20, %v2391_v36  ;;  %v992_v25 = vadd.f32 %v977_v21, %v2397_v39  ;;  %v993_v0 = vadd.f32 %v978_v22, %v2395_v38 }
 0x512   :  { %v994_v26 = vadd.f32 %v979_v2, %v2401_v41  ;;  %v996_v11 = vadd.f32 %v980_v23, %v2405_v43  ;;  %v997_v14 = vadd.f32 %v981_v3, %v2403_v42  ;;  %v1003_v44 = vmax.f32 %v995_v7, 0.0 }
 0x513   :  { %v998_v45 = vmax.f32 %v990_v24, 0.0  ;;  %v999_v46 = vmax.f32 %v991_v9, 0.0  ;;  %v1000_v47 = vmax.f32 %v992_v25, 0.0  ;;  %v1001_v48 = vmax.f32 %v993_v0, 0.0 }
 0x514   :  { %v1002_v49 = vmax.f32 %v994_v26, 0.0  ;;  %v1004_v50 = vmax.f32 %v996_v11, 0.0  ;;  %v1005_v51 = vmax.f32 %v997_v14, 0.0  ;;  %1011 = vst [vmem:[#allocation8 + $0x28] sm:$0x20] %v1003_v44 }
 0x515   :  { %1006 = vst [vmem:[#allocation8] sm:$0x20] %v998_v45  ;;  %1007 = vst [vmem:[#allocation8 + $0x8] sm:$0x20] %v999_v46  ;;  %v1022_v52 = vrot.slane %v998_v45, 5  ;;  %v1023_v53 = vrot.slane %v999_v46, 4 }
 0x516   :  { %1008 = vst [vmem:[#allocation8 + $0x10] sm:$0x20] %v1000_v47  ;;  %1009 = vst [vmem:[#allocation8 + $0x18] sm:$0x20] %v1001_v48  ;;  %v1025_v54 = vrot.slane %v1000_v47, 3  ;;  %v1027_v56 = vrot.slane %v1001_v48, 2 }
 0x517   :  { %1010 = vst [vmem:[#allocation8 + $0x20] sm:$0x20] %v1002_v49  ;;  %1012 = vst [vmem:[#allocation8 + $0x30] sm:$0x20] %v1004_v50  ;;  %v1024_v55 = vsel %vm351_vm3, %v1023_v53, %v1022_v52  ;;  %v1029_v58 = vrot.slane %v1002_v49, 1  ;;  %v1032_v61 = vrot.slane %v1004_v50, 7 }
 0x518   :  { %1013 = vst [vmem:[#allocation8 + $0x38] sm:$0x20] %v1005_v51  ;;  %v1026_v57 = vsel %vm354_vm4, %v1025_v54, %v1024_v55  ;;  %v1034_v63 = vrot.slane %v1005_v51, 6 }
 0x519   :  { %v1028_v59 = vsel %vm357_vm5, %v1027_v56, %v1026_v57  ;;  %v1320_v57 = vld [vmem:[#allocation6 + $0x38] sm:$0xff] }
 0x51a   :  { %v1030_v60 = vsel %vm360_vm6, %v1029_v58, %v1028_v59  ;;  %v1319_v58 = vld [vmem:[#allocation6 + $0x30] sm:$0xff]  ;;  %v1318_v59 = vld [vmem:[#allocation6 + $0x28] sm:$0xff] }
 0x51b   :  { %v1031_v62 = vsel %vm363_vm7, %v1003_v44, %v1030_v60  ;;  %v1317_v60 = vld [vmem:[#allocation6 + $0x20] sm:$0xff] }
 0x51c   :  { %v1033_v4 = vsel %vm366_vm8, %v1032_v61, %v1031_v62  ;;  %v1316_v61 = vld [vmem:[#allocation6 + $0x18] sm:$0xff]  ;;  %v1315_v62 = vld [vmem:[#allocation6 + $0x10] sm:$0xff] }
 0x51d   :  { %v1035_v5 = vsel %vm369_vm9, %v1034_v63, %v1033_v4  ;;  %v1314_v63 = vld [vmem:[#allocation6 + $0x8] sm:$0xff]  ;;  %v1313_v4 = vld [vmem:[#allocation6] sm:$0xff] }
 0x51e   :  { %1938 = vmatmul.mubr.f32.vlgmr.msra.gmra.mxu1 %v1035_v5 }
 0x51f   :  { %1976 = vmatpush3.msra.mxu1 %v1328_v6 }
 0x520   :  { %1977 = vmatprep.subr.mxu1 %v1327_v8 }
 0x521   :  { %1978 = vmatpush3.msra.mxu1 %v1327_v8 }
 0x522   :  { %1979 = vmatprep.subr.mxu1 %v1326_v10 }
 0x523   :  { %1980 = vmatpush3.msra.mxu1 %v1326_v10 }
 0x524   :  { %1981 = vmatprep.subr.mxu1 %v1325_v12 }
 0x525   :  { %1982 = vmatpush3.msra.mxu1 %v1325_v12 }
 0x526   :  { %1983 = vmatprep.subr.mxu1 %v1324_v13 }
 0x527   :  { %1984 = vmatpush3.msra.mxu1 %v1324_v13 }
 0x528   :  { %1985 = vmatprep.subr.mxu1 %v1323_v15 }
 0x529   :  { %1986 = vmatpush3.msra.mxu1 %v1323_v15 }
 0x52a   :  { %1987 = vmatprep.subr.mxu1 %v1322_v17 }
 0x52b   :  { %1988 = vmatpush3.msra.mxu1 %v1322_v17 }
 0x52c   :  { %1989 = vmatprep.subr.mxu1 %v1321_v19 }
 0x52d   :  { %1990 = vmatpush3.msra.mxu1 %v1321_v19 }
 0x52e   :  { %1991 = vmatprep.subr.mxu1 %v1320_v57 }
 0x52f   :  { %1992 = vmatpush3.msra.mxu1 %v1320_v57 }
 0x530   :  { %1993 = vmatprep.subr.mxu1 %v1319_v58 }
 0x531   :  { %1994 = vmatpush3.msra.mxu1 %v1319_v58 }
 0x532   :  { %1995 = vmatprep.subr.mxu1 %v1318_v59 }
 0x533   :  { %1996 = vmatpush3.msra.mxu1 %v1318_v59 }
 0x534   :  { %1997 = vmatprep.subr.mxu1 %v1317_v60 }
 0x535   :  { %1998 = vmatpush3.msra.mxu1 %v1317_v60 }
 0x536   :  { %1999 = vmatprep.subr.mxu1 %v1316_v61 }
 0x537   :  { %2000 = vmatpush3.msra.mxu1 %v1316_v61 }
 0x538   :  { %2001 = vmatprep.subr.mxu1 %v1315_v62 }
 0x539   :  { %2002 = vmatpush3.msra.mxu1 %v1315_v62 }
 0x53a   :  { %2003 = vmatprep.subr.mxu1 %v1314_v63 }
 0x53b   :  { %2004 = vmatpush3.msra.mxu1 %v1314_v63 }
 0x53c   :  { %2005 = vmatprep.subr.mxu1 %v1313_v4 }
 0x53d   :  { %2006 = vmatpush3.msra.mxu1 %v1313_v4 }
 0x5de   :  { %v1103_v27 = vpop.f32.mrf.mxu1 }
 0x5df   :  { %v1108_v28 = vrot.slane %v1103_v27, 2  ;;  %v1109_v29 = vrot.slane %v1103_v27, 3  ;;  %v1110_v30 = vrot.slane %v1103_v27, 4  ;;  %v1111_v31 = vrot.slane %v1103_v27, 5 }
 0x5e0   :  { %v1939_v32 = vpop.f32.mrf.mxu1  ;;  %v1112_v33 = vrot.slane %v1103_v27, 6  ;;  %v1113_v34 = vrot.slane %v1103_v27, 7  ;;  %v1114_v35 = vrot.slane %v1103_v27, 1  ;;  %v1129_v16 = vadd.f32 %v1103_v27, %v2405_v43 }
 0x5e1   :  { %v1123_v18 = vadd.f32 %v1108_v28, %v2393_v37  ;;  %v1124_v20 = vadd.f32 %v1109_v29, %v2391_v36  ;;  %v1125_v21 = vadd.f32 %v1110_v30, %v2397_v39  ;;  %v1126_v22 = vadd.f32 %v1111_v31, %v2395_v38 }
 0x5e2   :  { %v1127_v1 = vadd.f32 %v1112_v33, %v2401_v41  ;;  %v1128_v2 = vadd.f32 %v1113_v34, %v2399_v40  ;;  %v1130_v23 = vadd.f32 %v1114_v35, %v2403_v42  ;;  %v1137_v3 = vmax.f32 %v1129_v16, 0.0 }
 0x5e3   :  { %v1131_v7 = vmax.f32 %v1123_v18, 0.0  ;;  %v1132_v24 = vmax.f32 %v1124_v20, 0.0  ;;  %v1133_v9 = vmax.f32 %v1125_v21, 0.0  ;;  %v1134_v25 = vmax.f32 %v1126_v22, 0.0 }
 0x5e4   :  { %v1135_v0 = vmax.f32 %v1127_v1, 0.0  ;;  %v1136_v26 = vmax.f32 %v1128_v2, 0.0  ;;  %v1138_v11 = vmax.f32 %v1130_v23, 0.0  ;;  %1145 = vst [vmem:[#allocation8 + $0x30] sm:$0x40] %v1137_v3 }
 0x5e5   :  { %1139 = vst [vmem:[#allocation8] sm:$0x40] %v1131_v7  ;;  %1140 = vst [vmem:[#allocation8 + $0x8] sm:$0x40] %v1132_v24  ;;  %v1155_v14 = vrot.slane %v1131_v7, 6  ;;  %v1156_v44 = vrot.slane %v1132_v24, 5 }
 0x5e6   :  { %1141 = vst [vmem:[#allocation8 + $0x10] sm:$0x40] %v1133_v9  ;;  %1142 = vst [vmem:[#allocation8 + $0x18] sm:$0x40] %v1134_v25  ;;  %v1158_v45 = vrot.slane %v1133_v9, 4  ;;  %v1160_v47 = vrot.slane %v1134_v25, 3 }
 0x5e7   :  { %1143 = vst [vmem:[#allocation8 + $0x20] sm:$0x40] %v1135_v0  ;;  %1144 = vst [vmem:[#allocation8 + $0x28] sm:$0x40] %v1136_v26  ;;  %v1157_v46 = vsel %vm351_vm3, %v1156_v44, %v1155_v14  ;;  %v1162_v49 = vrot.slane %v1135_v0, 2  ;;  %v1164_v51 = vrot.slane %v1136_v26, 1 }
 0x5e8   :  { %1146 = vst [vmem:[#allocation8 + $0x38] sm:$0x40] %v1138_v11  ;;  %v1159_v48 = vsel %vm354_vm4, %v1158_v45, %v1157_v46  ;;  %v1167_v54 = vrot.slane %v1138_v11, 7 }
 0x5e9   :  { %v1161_v50 = vsel %vm357_vm5, %v1160_v47, %v1159_v48 }
 0x5ea   :  { %v1163_v52 = vsel %vm360_vm6, %v1162_v49, %v1161_v50 }
 0x5eb   :  { %v1165_v53 = vsel %vm363_vm7, %v1164_v51, %v1163_v52 }
 0x5ec   :  { %v1166_v55 = vsel %vm366_vm8, %v1137_v3, %v1165_v53 }
 0x5ed   :  { %v1168_v56 = vsel %vm369_vm9, %v1167_v54, %v1166_v55 }
 0x5ee   :  { %1973 = vmatmul.mubr.f32.vlgmr.msra.gmra.mxu0 %v1168_v56 }
 0x6ae   :  { %v1236_v5 = vpop.f32.mrf.mxu0 }
 0x6af   :  { %v1241_v6 = vrot.slane %v1236_v5, 1  ;;  %v1242_v8 = vrot.slane %v1236_v5, 2  ;;  %v1243_v10 = vrot.slane %v1236_v5, 3  ;;  %v1244_v12 = vrot.slane %v1236_v5, 4 }
 0x6b0   :  { %v1245_v13 = vrot.slane %v1236_v5, 5  ;;  %v1246_v15 = vrot.slane %v1236_v5, 6  ;;  %v1247_v17 = vrot.slane %v1236_v5, 7  ;;  %v1263_v19 = vadd.f32 %v1236_v5, %v2403_v42  ;;  %v1974_v27 = vpop.f32.mrf.mxu0 }
 0x6b1   :  { %v1256_v28 = vadd.f32 %v1241_v6, %v2393_v37  ;;  %v1257_v29 = vadd.f32 %v1242_v8, %v2391_v36  ;;  %v1258_v30 = vadd.f32 %v1243_v10, %v2397_v39  ;;  %v1259_v31 = vadd.f32 %v1244_v12, %v2395_v38 }
 0x6b2   :  { %v1260_v32 = vadd.f32 %v1245_v13, %v2401_v41  ;;  %v1261_v33 = vadd.f32 %v1246_v15, %v2399_v40  ;;  %v1262_v34 = vadd.f32 %v1247_v17, %v2405_v43  ;;  %v1271_v35 = vmax.f32 %v1263_v19, 0.0 }
 0x6b3   :  { %v1264_v16 = vmax.f32 %v1256_v28, 0.0  ;;  %v1265_v18 = vmax.f32 %v1257_v29, 0.0  ;;  %v1266_v20 = vmax.f32 %v1258_v30, 0.0  ;;  %v1267_v42 = vmax.f32 %v1259_v31, 0.0 }
 0x6b4   :  { %v1268_v21 = vmax.f32 %v1260_v32, 0.0  ;;  %v1269_v22 = vmax.f32 %v1261_v33, 0.0  ;;  %v1270_v37 = vmax.f32 %v1262_v34, 0.0  ;;  %1279 = vst [vmem:[#allocation8 + $0x38] sm:$0x80] %v1271_v35  ;;  %v1299_v7 = vrot.slane %v1271_v35, 1 }
 0x6b5   :  { %1272 = vst [vmem:[#allocation8] sm:$0x80] %v1264_v16  ;;  %1273 = vst [vmem:[#allocation8 + $0x8] sm:$0x80] %v1265_v18  ;;  %v1288_v36 = vrot.slane %v1265_v18, 7  ;;  %v1289_v38 = vrot.slane %v1266_v20, 6 }
 0x6b6   :  { %1274 = vst [vmem:[#allocation8 + $0x10] sm:$0x80] %v1266_v20  ;;  %1275 = vst [vmem:[#allocation8 + $0x18] sm:$0x80] %v1267_v42  ;;  %v1291_v39 = vrot.slane %v1267_v42, 5  ;;  %v1293_v41 = vrot.slane %v1268_v21, 4 }
 0x6b7   :  { %1452 = vst [vmem:[#allocation11 - $0x7] sm:$0x80] %v1264_v16  ;;  %1276 = vst [vmem:[#allocation8 + $0x20] sm:$0x80] %v1268_v21  ;;  %v1290_v40 = vsel %vm351_vm3, %v1289_v38, %v1288_v36  ;;  %v1295_v1 = vrot.slane %v1269_v22, 3  ;;  %v1297_v23 = vrot.slane %v1270_v37, 2 }
 0x6b8   :  { %1277 = vst [vmem:[#allocation8 + $0x28] sm:$0x80] %v1269_v22  ;;  %1278 = vst [vmem:[#allocation8 + $0x30] sm:$0x80] %v1270_v37  ;;  %v1292_v43 = vsel %vm354_vm4, %v1291_v39, %v1290_v40 }
 0x6b9   :  { %v1294_v2 = vsel %vm357_vm5, %v1293_v41, %v1292_v43 }
 0x6ba   :  { %v1296_v3 = vsel %vm360_vm6, %v1295_v1, %v1294_v2 }
 0x6bb   :  { %v1298_v24 = vsel %vm363_vm7, %v1297_v23, %v1296_v3  ;;  %v1312_v46 = vld [vmem:[#allocation8 + $0x38] sm:$0xff] }
 0x6bc   :  { %v1305_v9 = vld [vmem:[#allocation8] sm:$0xff]  ;;  %v1306_v25 = vld [vmem:[#allocation8 + $0x8] sm:$0xff]  ;;  %v1300_v0 = vsel %vm366_vm8, %v1299_v7, %v1298_v24 }
 0x6bd   :  { %2007 = vmatprep.mubr.f32.mxu1 %v1305_v9  ;;  %1453 = vst [vmem:[#allocation11 + $0x1] sm:$0x7f] %v1300_v0  ;;  %v1307_v26 = vld [vmem:[#allocation8 + $0x10] sm:$0xff]  ;;  %v1308_v11 = vld [vmem:[#allocation8 + $0x18] sm:$0xff] }
 0x6be   :  { %2008 = vmatmul.mubr.f32.vlgmr.msra.gmra.mxu1 %v1306_v25  ;;  %v1309_v14 = vld [vmem:[#allocation8 + $0x20] sm:$0xff] }
 0x6bf   :  { %2010 = vmatprep.mubr.f32.mxu1 %v1307_v26  ;;  %v1310_v44 = vld [vmem:[#allocation8 + $0x28] sm:$0xff]  ;;  %v1311_v45 = vld [vmem:[#allocation8 + $0x30] sm:$0xff] }
 0x6c2   :  { %2011 = vmatmul.mubr.f32.gmra.mxu1 %v1308_v11 }
 0x6c3   :  { %2013 = vmatprep.mubr.f32.mxu1 %v1309_v14 }
 0x6c6   :  { %2014 = vmatmul.mubr.f32.gmra.mxu1 %v1310_v44 }
 0x6c7   :  { %2016 = vmatprep.mubr.f32.mxu1 %v1311_v45 }
 0x6ca   :  { %2017 = vmatmul.mubr.f32.gmra.mxu1 %v1312_v46 }
 0x6cb   :  { %2086 = shalt.err (!%p2083_p0)
}
 0x6cc   :  { %1465 = dma.vmem_to_hbm [thread:$0]  %s1460_s19, 1024, %s2712_s7, [#allocation5], %s2144_s12, %s2144_s12, %s2145_s13  }
 0x6cd   :  { %v1511_v47 = vld [vmem:[%s2711_s6] ss:$0 sm:$0xff]  ;;  %s2150_s7 = smov [#allocation9]   ;;  %s2151_s23 = smov [#allocation11]  }
 0x6ce   :  { %s1471_s6 = sshll.u32 %s2150_s7, 4  ;;  %s1484_s24 = sshll.u32 %s2151_s23, 4  ;;  %s1472_s6 = int_to_ptr.vmem [resolvable:$true] %s1471_s6  ;;  %s1485_s24 = int_to_ptr.vmem [resolvable:$true] %s1484_s24 }
 0x6cf   :  { %s2095_s25 = scalar_lea.vmem %s1472_s6, 1024  ;;  %p2100_p2 = scmp.lt.s32.totalorder %s1472_s6, %s1472_s6 }
 0x6d0   :  { %p2096_p1 = scmp.ne.s32.totalorder %s1472_s6, %s2095_s25  ;;  %p2101_p3 = scmp.lt.s32.totalorder %s2095_s25, %s2095_s25 }
 0x6d2   :  { %p2102_p4 = por %p2101_p3, %p2100_p2 }
 0x6d4   :  { %p2103_p5 = pnand %p2102_p4, %p2096_p1 }
 0x77e   :  { %v2009_v48 = vpop.f32.mrf.mxu1 }
 0x77f   :  { %v1408_v49 = vadd.f32 %v2009_v48, %v1511_v47 }
 0x780   :  { %v1402_v50 = vpop.f32.mrf.mxu1 }
 0x781   :  { %1442 = vst [vmem:[#allocation9 + $0x8] sm:$0xff] %v1408_v49  ;;  %v1403_v51 = vadd.f32 %v1511_v47, %v1402_v50 }
 0x782   :  { %v2012_v52 = vpop.f32.mrf.mxu1 }
 0x783   :  { %1441 = vst [vmem:[#allocation9] sm:$0xff] %v1403_v51  ;;  %v1418_v53 = vadd.f32 %v2012_v52, %v1511_v47 }
 0x784   :  { %v1412_v54 = vpop.f32.mrf.mxu1 }
 0x785   :  { %1444 = vst [vmem:[#allocation9 + $0x18] sm:$0xff] %v1418_v53  ;;  %v1413_v55 = vadd.f32 %v1511_v47, %v1412_v54 }
 0x786   :  { %v2015_v56 = vpop.f32.mrf.mxu1 }
 0x787   :  { %1443 = vst [vmem:[#allocation9 + $0x10] sm:$0xff] %v1413_v55  ;;  %v1428_v57 = vadd.f32 %v2015_v56, %v1511_v47 }
 0x788   :  { %v1422_v58 = vpop.f32.mrf.mxu1 }
 0x789   :  { %1446 = vst [vmem:[#allocation9 + $0x28] sm:$0xff] %v1428_v57  ;;  %v1423_v59 = vadd.f32 %v1511_v47, %v1422_v58 }
 0x78a   :  { %v2018_v60 = vpop.f32.mrf.mxu1 }
 0x78b   :  { %1445 = vst [vmem:[#allocation9 + $0x20] sm:$0xff] %v1423_v59  ;;  %v1438_v61 = vadd.f32 %v2018_v60, %v1511_v47 }
 0x78c   :  { %v1432_v62 = vpop.f32.mrf.mxu1 }
 0x78d   :  { %1448 = vst [vmem:[#allocation9 + $0x38] sm:$0xff] %v1438_v61  ;;  %v1433_v63 = vadd.f32 %v1511_v47, %v1432_v62 }
 0x78f   :  { %1447 = vst [vmem:[#allocation9 + $0x30] sm:$0xff] %v1433_v63 }
 0x790   :  { %2106 = shalt.err (!%p2103_p5)
}
 0x791   :  { %1477 = dma.vmem_to_hbm [thread:$0]  %s1472_s6, 1024, %s2713_s8, [#allocation10], %s2144_s12, %s2144_s12, %s2145_s13  }
 0x792   :  { %s2115_s27 = scalar_lea.vmem %s1485_s24, 128  ;;  %p2120_p7 = scmp.lt.s32.totalorder %s1485_s24, %s1485_s24 }
 0x793   :  { %p2116_p6 = scmp.ne.s32.totalorder %s1485_s24, %s2115_s27  ;;  %p2121_p8 = scmp.lt.s32.totalorder %s2115_s27, %s2115_s27 }
 0x795   :  { %p2122_p9 = por %p2121_p8, %p2120_p7 }
 0x797   :  { %p2123_p10 = pnand %p2122_p9, %p2116_p6 }
 0x799   :  { %2126 = shalt.err (!%p2123_p10)
}
 0x79a   :  { %1487 = dma.vmem_to_hbm [thread:$0]  %s1485_s24, 128, %s2714_s9, [#allocation10]  }
 0x79b   :  { %2139 = dma.done.wait [#allocation5], 1024  }
 0x79c   :  { %2140 = vsyncadd [#allocation5], 4294966272 }
 0x79d   :  { %2141 = dma.done.wait [#allocation10], 1152  }
 0x79e   :  { %2142 = vsyncadd [#allocation10], 4294966144 }
 0x79f   :  { %1497 = vsyncpa [#allocation4], 1 }
 0x7a0   :  { %1498 = vsyncpa [#allocation7], 1 }
 0x7a1   :  { %1499 = vsyncpa [#allocation5], 1 }
 0x7a2   :  { %1500 = vsyncpa [#allocation10], 1 }

</bundles_post_ra>
